<compile_context>
chip_gen: v5e
topology: v5e:2x2
jax: 0.10.0
libtpu: 0.0.40
codegen_flags: <defaults>
</compile_context>

<pallas_src>
import functools

import jax
import jax.numpy as jnp
from jax import lax
from jax.experimental import pallas as pl
from jax.experimental.pallas import tpu as pltpu

MAX_LOG2NUM = 16
NEG_SLOPE = 0.05
BN_EPS = 1e-5


# ----------------------------------------------------------------------------
# Pallas kernel: whole forward pass.  All operands live fully in VMEM
# (tiny shapes, no grid).
# ----------------------------------------------------------------------------
def _value_cnn_kernel(B, Bp, apply_exp,
                      board_ref, w1_ref, b1_ref, g1_ref, be1_ref,
                      w2_ref, b2_ref, g2_ref, be2_ref,
                      w4_ref, b4_ref, g4_ref, be4_ref,
                      w5_ref, b5_ref, o_ref):
    f32 = jnp.float32
    bf16 = jnp.bfloat16
    padded = Bp != B

    def leaky(x):
        # max(x, 0.05*x) == LeakyReLU(0.05) for all x; 2 VALU ops.
        return jnp.maximum(x, NEG_SLOPE * x)

    # Base batch mask, built once; per-layer masks are cheap block concats.
    if padded:
        rows = lax.broadcasted_iota(jnp.int32, (Bp, 1), 0)
        base_mask = (rows < B).astype(f32)                      # (Bp,1)
    else:
        base_mask = None

    def bn_stats(x, nblk, count):
        # One-pass masked stats: mu = sum(x*m)/count, var = E[x^2] - mu^2.
        # Cancellation is benign in f32 for these unit-scale activations;
        # clamp var >= 0 anyway.
        if base_mask is None:
            s1 = jnp.sum(x, axis=0, keepdims=True)
            s2 = jnp.sum(x * x, axis=0, keepdims=True)
        else:
            m = base_mask if nblk == 1 else jnp.concatenate([base_mask] * nblk,
                                                            axis=0)
            s1 = jnp.sum(x * m, axis=0, keepdims=True)
            s2 = jnp.sum(x * x * m, axis=0, keepdims=True)
        inv_n = 1.0 / count
        mu = s1 * inv_n
        var = jnp.maximum(s2 * inv_n - mu * mu, 0.0)
        return mu, var

    def bn_apply(x, nblk, count, g, b):
        mu, var = bn_stats(x, nblk, count)
        scale = lax.rsqrt(var + BN_EPS) * g                     # (1,C)
        shift = b - mu * scale                                  # (1,C)
        return x * scale + shift                                # fused normalize

    # ---- In-kernel preprocess: exact floor(log2(1+s)) one-hot -------------
    v = 1.0 + board_ref[...]                                    # (Bp,16) exact ints
    e = (pltpu.bitcast(v, jnp.int32) >> 23) - 127               # exact exponent
    lane_c = lax.broadcasted_iota(jnp.int32, (Bp, MAX_LOG2NUM), 1)
    # one-hot of each of the 16 board cells: 16 x (Bp,16) f32
    oh = [jnp.where(e[:, j:j + 1] == lane_c, 1.0, 0.0).astype(f32)
          for j in range(16)]

    # ---- Conv1 im2col: row block p = oy*3+ox, column = (kh*2+kw)*16 + c ----
    x1_blocks = []
    for oy in range(3):
        for ox in range(3):
            cells = [oh[(oy + kh) * 4 + (ox + kw)]
                     for kh in range(2) for kw in range(2)]
            x1_blocks.append(jnp.concatenate(cells, axis=-1).astype(bf16))  # (Bp,64)
    x1 = jnp.concatenate(x1_blocks, axis=0)                     # (9Bp,64) bf16

    h1 = jnp.dot(x1, w1_ref[...], preferred_element_type=f32)   # (9Bp,128)
    h1 = leaky(h1 + b1_ref[...])
    h1 = bn_apply(h1, 9, 9.0 * B, g1_ref[...], be1_ref[...])    # N*H*W = 9B rows

    # ---- Conv2: im2col built from bf16 h1 blocks (cast BEFORE the concats) -
    h1b = h1.astype(bf16).reshape(9, Bp, 128)
    pos_rows = []
    for oy in range(2):
        for ox in range(2):
            blocks = [h1b[(oy + dy) * 3 + (ox + dx)]
                      for dy in range(2) for dx in range(2)]     # k = dy*2+dx
            pos_rows.append(jnp.concatenate(blocks, axis=-1))    # (Bp,512) bf16
    x2 = jnp.concatenate(pos_rows, axis=0)                       # (4Bp,512) bf16
    h2 = jnp.dot(x2, w2_ref[...], preferred_element_type=f32)    # (4Bp,128)
    h2 = leaky(h2 + b2_ref[...])
    h2 = bn_apply(h2, 4, 4.0 * B, g2_ref[...], be2_ref[...])     # N*H*W = 4B rows

    # ---- Flatten + Lin4 (512 -> 64): bf16 blocks, one K=512 matmul ---------
    h2b = h2.astype(bf16).reshape(4, Bp, 128)
    zin = jnp.concatenate([h2b[p] for p in range(4)], axis=-1)   # (Bp,512) bf16
    z = jnp.dot(zin, w4_ref[...], preferred_element_type=f32)    # (Bp,64)
    z = leaky(z + b4_ref[...])

    # ---- BN4 fused into the Lin5 lane reduce (never materialize norm(z)) ---
    mu4, var4 = bn_stats(z, 1, 1.0 * B)
    cvec = lax.rsqrt(var4 + BN_EPS) * g4_ref[...] * w5_ref[...]  # (1,64)
    shift = jnp.sum(be4_ref[...] * w5_ref[...] - mu4 * cvec,
                    axis=-1, keepdims=True) + b5_ref[...]        # (1,1)
    out = jnp.sum(z * cvec, axis=-1, keepdims=True) + shift      # (Bp,1)
    o_ref[...] = jnp.exp(out) if apply_exp else out


# ----------------------------------------------------------------------------
# Plain-JAX glue: exact preprocess helper, weight re-layout, wrapper.
# ----------------------------------------------------------------------------
def _floor_log2_1p(x):
    """Exact floor(log2(1+x)) for non-negative integer-valued boards (< 2^24)."""
    v = 1.0 + x.astype(jnp.float32)
    bits = lax.bitcast_convert_type(v, jnp.int32)
    return (bits >> 23) - 127


def preprocess(stateseq):
    logstate = _floor_log2_1p(stateseq)                          # (B,4,4) int32
    onehot = jax.nn.one_hot(logstate, MAX_LOG2NUM, dtype=jnp.float32)
    return jnp.transpose(onehot, (0, 3, 1, 2))                   # NCHW (B,16,4,4)


def prepare_params(params):
    """One-time re-layout of torch-layout weights into kernel matmul layouts."""
    row = lambda v: jnp.asarray(v, jnp.float32).reshape(1, -1)
    bf16 = jnp.bfloat16
    return {
        # Conv1 (out,in,kh,kw) -> rows ordered (kh,kw,in): (64, 128)
        "w1": jnp.transpose(jnp.asarray(params["w1"]),
                            (2, 3, 1, 0)).reshape(64, 128).astype(bf16),
        # Conv2 (out,in,kh,kw) -> rows ordered (kh,kw,in): (512, 128)
        "w2": jnp.transpose(jnp.asarray(params["w2"]),
                            (2, 3, 1, 0)).reshape(512, 128).astype(bf16),
        # Lin4 (64, c*4+oy*2+ox) -> rows ordered ((oy*2+ox)*128 + c): (512, 64)
        "w4": jnp.transpose(jnp.asarray(params["w4"]).reshape(64, 128, 2, 2),
                            (2, 3, 1, 0)).reshape(512, 64).astype(bf16),
        "w5": row(params["w5"]),                                  # (1,64) f32
        "b1": row(params["b1"]), "g1": row(params["g1"]), "be1": row(params["be1"]),
        "b2": row(params["b2"]), "g2": row(params["g2"]), "be2": row(params["be2"]),
        "b4": row(params["b4"]), "g4": row(params["g4"]), "be4": row(params["be4"]),
        "b5": row(params["b5"]),                                  # (1,1) f32
    }


@functools.partial(jax.jit, static_argnames=("exp",))
def value_cnn_forward(stateseq, kparams, exp=True):
    B = stateseq.shape[0]
    Bp = -(-B // 16) * 16        # pad batch so bf16 (16,128) sublane tiles stay aligned
    board = stateseq.astype(jnp.float32).reshape(B, 16)
    if Bp != B:
        board = jnp.pad(board, ((0, Bp - B), (0, 0)))

    args = (board,
            kparams["w1"], kparams["b1"], kparams["g1"], kparams["be1"],
            kparams["w2"], kparams["b2"], kparams["g2"], kparams["be2"],
            kparams["w4"], kparams["b4"], kparams["g4"], kparams["be4"],
            kparams["w5"], kparams["b5"])

    vmem = lambda: pl.BlockSpec(memory_space=pltpu.MemorySpace.VMEM)
    out = pl.pallas_call(
        functools.partial(_value_cnn_kernel, B, Bp, exp),
        out_shape=jax.ShapeDtypeStruct((Bp, 1), jnp.float32),
        in_specs=[vmem() for _ in args],
        out_specs=vmem(),
        # 48 MiB: under v7x's 64 MiB physical VMEM with headroom; can be raised
        # on v5e/v6e (128 MiB) for larger fully-resident batches.
        compiler_params=pltpu.CompilerParams(vmem_limit_bytes=48 * 1024 * 1024),
    )(*args)
    return out[:B] if Bp != B else out


# ----------------------------------------------------------------------------
# Deterministic synthetic parameters (torch layouts) + pure-JAX reference.
# ----------------------------------------------------------------------------
def init_params(key):
    ks = jax.random.split(key, 16)

    def u(k, shape, fan_in):
        bound = 1.0 / float(fan_in) ** 0.5
        return jax.random.uniform(k, shape, jnp.float32, -bound, bound)

    p = {}
    p["w1"] = u(ks[0], (128, MAX_LOG2NUM, 2, 2), MAX_LOG2NUM * 4)
    p["b1"] = u(ks[1], (128,), MAX_LOG2NUM * 4)
    p["w2"] = u(ks[2], (128, 128, 2, 2), 128 * 4)
    p["b2"] = u(ks[3], (128,), 128 * 4)
    p["w4"] = u(ks[4], (64, 512), 512)
    p["b4"] = u(ks[5], (64,), 512)
    p["w5"] = u(ks[6], (1, 64), 64)
    p["b5"] = u(ks[7], (1,), 64)
    p["g1"] = 1.0 + 0.1 * jax.random.normal(ks[8], (128,), jnp.float32)
    p["be1"] = 0.1 * jax.random.normal(ks[9], (128,), jnp.float32)
    p["g2"] = 1.0 + 0.1 * jax.random.normal(ks[10], (128,), jnp.float32)
    p["be2"] = 0.1 * jax.random.normal(ks[11], (128,), jnp.float32)
    p["g4"] = 1.0 + 0.1 * jax.random.normal(ks[12], (64,), jnp.float32)
    p["be4"] = 0.1 * jax.random.normal(ks[13], (64,), jnp.float32)
    return p


def reference_forward(stateseq, params, exp=True):
    """Pure-JAX emulation of the PyTorch module (training-mode batch norm)."""
    B = stateseq.shape[0]
    leaky = lambda x: jnp.where(x > 0, x, NEG_SLOPE * x)

    def bn(x, g, b, axes):
        mu = jnp.mean(x, axis=axes, keepdims=True)
        var = jnp.mean((x - mu) ** 2, axis=axes, keepdims=True)
        shp = [1] * x.ndim
        shp[1] = -1
        return (x - mu) * lax.rsqrt(var + BN_EPS) * g.reshape(shp) + b.reshape(shp)

    dn = ("NCHW", "OIHW", "NCHW")
    x = preprocess(stateseq)
    h = lax.conv_general_dilated(x, params["w1"], (1, 1), "VALID",
                                 dimension_numbers=dn,
                                 precision=lax.Precision.HIGHEST)
    h = leaky(h + params["b1"][None, :, None, None])
    h = bn(h, params["g1"], params["be1"], (0, 2, 3))
    h = lax.conv_general_dilated(h, params["w2"], (1, 1), "VALID",
                                 dimension_numbers=dn,
                                 precision=lax.Precision.HIGHEST)
    h = leaky(h + params["b2"][None, :, None, None])
    h = bn(h, params["g2"], params["be2"], (0, 2, 3))
    h = h.reshape(B, 512)                                   # torch Flatten: (c, oy, ox)
    h = jnp.matmul(h, params["w4"].T, precision=lax.Precision.HIGHEST) + params["b4"]
    h = leaky(h)
    h = bn(h, params["g4"], params["be4"], (0,))
    out = jnp.matmul(h, params["w5"].T, precision=lax.Precision.HIGHEST) + params["b5"]
    return jnp.exp(out) if exp else out


if __name__ == "__main__":
    key = jax.random.PRNGKey(0)
    pkey, dkey = jax.random.split(key)
    params = init_params(pkey)
    kparams = prepare_params(params)     # one-time weight re-layout (hoisted)

    # Padded-batch path (B=8 -> Bp=16), exp=True.
    B = 8
    stateseq = jax.random.randint(dkey, (B, 4, 4), 0, 1024).astype(jnp.float32)
    out = jax.block_until_ready(value_cnn_forward(stateseq, kparams, exp=True))
    ref = reference_forward(stateseq, params, exp=True)
    assert out.shape == (B, 1)
    assert bool(jnp.all(jnp.isfinite(out)))
    # Kernel uses bf16 MXU operands (f32 accumulate); reference is Precision.HIGHEST.
    assert bool(jnp.allclose(out, ref, rtol=5e-2, atol=5e-2)), "kernel != reference (padded)"

    # Unpadded path (B=16), exp=False.
    B2 = 16
    state2 = jax.random.randint(jax.random.PRNGKey(7), (B2, 4, 4), 0, 1024).astype(jnp.float32)
    out2 = jax.block_until_ready(value_cnn_forward(state2, kparams, exp=False))
    ref2 = reference_forward(state2, params, exp=False)
    assert out2.shape == (B2, 1)
    assert bool(jnp.all(jnp.isfinite(out2)))
    assert bool(jnp.allclose(out2, ref2, rtol=5e-2, atol=5e-2)), "kernel != reference (unpadded)"

    print("KERNEL_OK")
</pallas_src>

<mosaic_0001>
module attributes {stable_mosaic.version = 11 : i64} {
  func.func @_value_cnn_kernel(%arg0: memref<16x16xf32, #tpu.memory_space<vmem>>, %arg1: memref<64x128xbf16, #tpu.memory_space<vmem>>, %arg2: memref<1x128xf32, #tpu.memory_space<vmem>>, %arg3: memref<1x128xf32, #tpu.memory_space<vmem>>, %arg4: memref<1x128xf32, #tpu.memory_space<vmem>>, %arg5: memref<512x128xbf16, #tpu.memory_space<vmem>>, %arg6: memref<1x128xf32, #tpu.memory_space<vmem>>, %arg7: memref<1x128xf32, #tpu.memory_space<vmem>>, %arg8: memref<1x128xf32, #tpu.memory_space<vmem>>, %arg9: memref<512x64xbf16, #tpu.memory_space<vmem>>, %arg10: memref<1x64xf32, #tpu.memory_space<vmem>>, %arg11: memref<1x64xf32, #tpu.memory_space<vmem>>, %arg12: memref<1x64xf32, #tpu.memory_space<vmem>>, %arg13: memref<1x64xf32, #tpu.memory_space<vmem>>, %arg14: memref<1x1xf32, #tpu.memory_space<vmem>>, %arg15: memref<16x1xf32, #tpu.memory_space<vmem>>) attributes {dimension_semantics = [], scalar_prefetch = 0 : i64, scratch_operands = 0 : i64, tpu.core_type = #tpu.core_type<tc>} {
    %0 = tpu.iota {dimensions = array<i32: 0>} : vector<16x1xi32>
    %c8_i32 = arith.constant 8 : i32
    %1 = vector.broadcast %c8_i32 : i32 to vector<16x1xi32>
    %2 = arith.cmpi slt, %0, %1 : vector<16x1xi32>
    %3 = arith.extui %2 : vector<16x1xi1> to vector<16x1xi32>
    %4 = arith.sitofp %3 : vector<16x1xi32> to vector<16x1xf32>
    %c0 = arith.constant 0 : index
    %c0_0 = arith.constant 0 : index
    %5 = vector.load %arg0[%c0, %c0_0] : memref<16x16xf32, #tpu.memory_space<vmem>>, vector<16x16xf32>
    %cst = arith.constant 1.000000e+00 : f32
    %6 = vector.broadcast %cst : f32 to vector<16x16xf32>
    %7 = arith.addf %6, %5 : vector<16x16xf32>
    %8 = tpu.bitcast %7 : vector<16x16xf32> -> vector<16x16xi32>
    %c23_i32 = arith.constant 23 : i32
    %9 = vector.broadcast %c23_i32 : i32 to vector<16x16xi32>
    %10 = arith.shrsi %8, %9 : vector<16x16xi32>
    %c127_i32 = arith.constant 127 : i32
    %11 = vector.broadcast %c127_i32 : i32 to vector<16x16xi32>
    %12 = arith.subi %10, %11 : vector<16x16xi32>
    %13 = tpu.iota {dimensions = array<i32: 1>} : vector<16x16xi32>
    %14 = vector.extract_strided_slice %12 {offsets = [0, 0], sizes = [16, 1], strides = [1, 1]} : vector<16x16xi32> to vector<16x1xi32>
    %15 = vector.broadcast %14 : vector<16x1xi32> to vector<16x16xi32>
    %16 = arith.cmpi eq, %15, %13 : vector<16x16xi32>
    %cst_1 = arith.constant 1.000000e+00 : f32
    %cst_2 = arith.constant 0.000000e+00 : f32
    %17 = vector.broadcast %cst_1 : f32 to vector<16x16xf32>
    %18 = vector.broadcast %cst_2 : f32 to vector<16x16xf32>
    %19 = arith.select %16, %17, %18 : vector<16x16xi1>, vector<16x16xf32>
    %20 = vector.extract_strided_slice %12 {offsets = [0, 1], sizes = [16, 1], strides = [1, 1]} : vector<16x16xi32> to vector<16x1xi32>
    %21 = vector.broadcast %20 : vector<16x1xi32> to vector<16x16xi32>
    %22 = arith.cmpi eq, %21, %13 : vector<16x16xi32>
    %cst_3 = arith.constant 1.000000e+00 : f32
    %cst_4 = arith.constant 0.000000e+00 : f32
    %23 = vector.broadcast %cst_3 : f32 to vector<16x16xf32>
    %24 = vector.broadcast %cst_4 : f32 to vector<16x16xf32>
    %25 = arith.select %22, %23, %24 : vector<16x16xi1>, vector<16x16xf32>
    %26 = vector.extract_strided_slice %12 {offsets = [0, 2], sizes = [16, 1], strides = [1, 1]} : vector<16x16xi32> to vector<16x1xi32>
    %27 = vector.broadcast %26 : vector<16x1xi32> to vector<16x16xi32>
    %28 = arith.cmpi eq, %27, %13 : vector<16x16xi32>
    %cst_5 = arith.constant 1.000000e+00 : f32
    %cst_6 = arith.constant 0.000000e+00 : f32
    %29 = vector.broadcast %cst_5 : f32 to vector<16x16xf32>
    %30 = vector.broadcast %cst_6 : f32 to vector<16x16xf32>
    %31 = arith.select %28, %29, %30 : vector<16x16xi1>, vector<16x16xf32>
    %32 = vector.extract_strided_slice %12 {offsets = [0, 3], sizes = [16, 1], strides = [1, 1]} : vector<16x16xi32> to vector<16x1xi32>
    %33 = vector.broadcast %32 : vector<16x1xi32> to vector<16x16xi32>
    %34 = arith.cmpi eq, %33, %13 : vector<16x16xi32>
    %cst_7 = arith.constant 1.000000e+00 : f32
    %cst_8 = arith.constant 0.000000e+00 : f32
    %35 = vector.broadcast %cst_7 : f32 to vector<16x16xf32>
    %36 = vector.broadcast %cst_8 : f32 to vector<16x16xf32>
    %37 = arith.select %34, %35, %36 : vector<16x16xi1>, vector<16x16xf32>
    %38 = vector.extract_strided_slice %12 {offsets = [0, 4], sizes = [16, 1], strides = [1, 1]} : vector<16x16xi32> to vector<16x1xi32>
    %39 = vector.broadcast %38 : vector<16x1xi32> to vector<16x16xi32>
    %40 = arith.cmpi eq, %39, %13 : vector<16x16xi32>
    %cst_9 = arith.constant 1.000000e+00 : f32
    %cst_10 = arith.constant 0.000000e+00 : f32
    %41 = vector.broadcast %cst_9 : f32 to vector<16x16xf32>
    %42 = vector.broadcast %cst_10 : f32 to vector<16x16xf32>
    %43 = arith.select %40, %41, %42 : vector<16x16xi1>, vector<16x16xf32>
    %44 = vector.extract_strided_slice %12 {offsets = [0, 5], sizes = [16, 1], strides = [1, 1]} : vector<16x16xi32> to vector<16x1xi32>
    %45 = vector.broadcast %44 : vector<16x1xi32> to vector<16x16xi32>
    %46 = arith.cmpi eq, %45, %13 : vector<16x16xi32>
    %cst_11 = arith.constant 1.000000e+00 : f32
    %cst_12 = arith.constant 0.000000e+00 : f32
    %47 = vector.broadcast %cst_11 : f32 to vector<16x16xf32>
    %48 = vector.broadcast %cst_12 : f32 to vector<16x16xf32>
    %49 = arith.select %46, %47, %48 : vector<16x16xi1>, vector<16x16xf32>
    %50 = vector.extract_strided_slice %12 {offsets = [0, 6], sizes = [16, 1], strides = [1, 1]} : vector<16x16xi32> to vector<16x1xi32>
    %51 = vector.broadcast %50 : vector<16x1xi32> to vector<16x16xi32>
    %52 = arith.cmpi eq, %51, %13 : vector<16x16xi32>
    %cst_13 = arith.constant 1.000000e+00 : f32
    %cst_14 = arith.constant 0.000000e+00 : f32
    %53 = vector.broadcast %cst_13 : f32 to vector<16x16xf32>
    %54 = vector.broadcast %cst_14 : f32 to vector<16x16xf32>
    %55 = arith.select %52, %53, %54 : vector<16x16xi1>, vector<16x16xf32>
    %56 = vector.extract_strided_slice %12 {offsets = [0, 7], sizes = [16, 1], strides = [1, 1]} : vector<16x16xi32> to vector<16x1xi32>
    %57 = vector.broadcast %56 : vector<16x1xi32> to vector<16x16xi32>
    %58 = arith.cmpi eq, %57, %13 : vector<16x16xi32>
    %cst_15 = arith.constant 1.000000e+00 : f32
    %cst_16 = arith.constant 0.000000e+00 : f32
    %59 = vector.broadcast %cst_15 : f32 to vector<16x16xf32>
    %60 = vector.broadcast %cst_16 : f32 to vector<16x16xf32>
    %61 = arith.select %58, %59, %60 : vector<16x16xi1>, vector<16x16xf32>
    %62 = vector.extract_strided_slice %12 {offsets = [0, 8], sizes = [16, 1], strides = [1, 1]} : vector<16x16xi32> to vector<16x1xi32>
    %63 = vector.broadcast %62 : vector<16x1xi32> to vector<16x16xi32>
    %64 = arith.cmpi eq, %63, %13 : vector<16x16xi32>
    %cst_17 = arith.constant 1.000000e+00 : f32
    %cst_18 = arith.constant 0.000000e+00 : f32
    %65 = vector.broadcast %cst_17 : f32 to vector<16x16xf32>
    %66 = vector.broadcast %cst_18 : f32 to vector<16x16xf32>
    %67 = arith.select %64, %65, %66 : vector<16x16xi1>, vector<16x16xf32>
    %68 = vector.extract_strided_slice %12 {offsets = [0, 9], sizes = [16, 1], strides = [1, 1]} : vector<16x16xi32> to vector<16x1xi32>
    %69 = vector.broadcast %68 : vector<16x1xi32> to vector<16x16xi32>
    %70 = arith.cmpi eq, %69, %13 : vector<16x16xi32>
    %cst_19 = arith.constant 1.000000e+00 : f32
    %cst_20 = arith.constant 0.000000e+00 : f32
    %71 = vector.broadcast %cst_19 : f32 to vector<16x16xf32>
    %72 = vector.broadcast %cst_20 : f32 to vector<16x16xf32>
    %73 = arith.select %70, %71, %72 : vector<16x16xi1>, vector<16x16xf32>
    %74 = vector.extract_strided_slice %12 {offsets = [0, 10], sizes = [16, 1], strides = [1, 1]} : vector<16x16xi32> to vector<16x1xi32>
    %75 = vector.broadcast %74 : vector<16x1xi32> to vector<16x16xi32>
    %76 = arith.cmpi eq, %75, %13 : vector<16x16xi32>
    %cst_21 = arith.constant 1.000000e+00 : f32
    %cst_22 = arith.constant 0.000000e+00 : f32
    %77 = vector.broadcast %cst_21 : f32 to vector<16x16xf32>
    %78 = vector.broadcast %cst_22 : f32 to vector<16x16xf32>
    %79 = arith.select %76, %77, %78 : vector<16x16xi1>, vector<16x16xf32>
    %80 = vector.extract_strided_slice %12 {offsets = [0, 11], sizes = [16, 1], strides = [1, 1]} : vector<16x16xi32> to vector<16x1xi32>
    %81 = vector.broadcast %80 : vector<16x1xi32> to vector<16x16xi32>
    %82 = arith.cmpi eq, %81, %13 : vector<16x16xi32>
    %cst_23 = arith.constant 1.000000e+00 : f32
    %cst_24 = arith.constant 0.000000e+00 : f32
    %83 = vector.broadcast %cst_23 : f32 to vector<16x16xf32>
    %84 = vector.broadcast %cst_24 : f32 to vector<16x16xf32>
    %85 = arith.select %82, %83, %84 : vector<16x16xi1>, vector<16x16xf32>
    %86 = vector.extract_strided_slice %12 {offsets = [0, 12], sizes = [16, 1], strides = [1, 1]} : vector<16x16xi32> to vector<16x1xi32>
    %87 = vector.broadcast %86 : vector<16x1xi32> to vector<16x16xi32>
    %88 = arith.cmpi eq, %87, %13 : vector<16x16xi32>
    %cst_25 = arith.constant 1.000000e+00 : f32
    %cst_26 = arith.constant 0.000000e+00 : f32
    %89 = vector.broadcast %cst_25 : f32 to vector<16x16xf32>
    %90 = vector.broadcast %cst_26 : f32 to vector<16x16xf32>
    %91 = arith.select %88, %89, %90 : vector<16x16xi1>, vector<16x16xf32>
    %92 = vector.extract_strided_slice %12 {offsets = [0, 13], sizes = [16, 1], strides = [1, 1]} : vector<16x16xi32> to vector<16x1xi32>
    %93 = vector.broadcast %92 : vector<16x1xi32> to vector<16x16xi32>
    %94 = arith.cmpi eq, %93, %13 : vector<16x16xi32>
    %cst_27 = arith.constant 1.000000e+00 : f32
    %cst_28 = arith.constant 0.000000e+00 : f32
    %95 = vector.broadcast %cst_27 : f32 to vector<16x16xf32>
    %96 = vector.broadcast %cst_28 : f32 to vector<16x16xf32>
    %97 = arith.select %94, %95, %96 : vector<16x16xi1>, vector<16x16xf32>
    %98 = vector.extract_strided_slice %12 {offsets = [0, 14], sizes = [16, 1], strides = [1, 1]} : vector<16x16xi32> to vector<16x1xi32>
    %99 = vector.broadcast %98 : vector<16x1xi32> to vector<16x16xi32>
    %100 = arith.cmpi eq, %99, %13 : vector<16x16xi32>
    %cst_29 = arith.constant 1.000000e+00 : f32
    %cst_30 = arith.constant 0.000000e+00 : f32
    %101 = vector.broadcast %cst_29 : f32 to vector<16x16xf32>
    %102 = vector.broadcast %cst_30 : f32 to vector<16x16xf32>
    %103 = arith.select %100, %101, %102 : vector<16x16xi1>, vector<16x16xf32>
    %104 = vector.extract_strided_slice %12 {offsets = [0, 15], sizes = [16, 1], strides = [1, 1]} : vector<16x16xi32> to vector<16x1xi32>
    %105 = vector.broadcast %104 : vector<16x1xi32> to vector<16x16xi32>
    %106 = arith.cmpi eq, %105, %13 : vector<16x16xi32>
    %cst_31 = arith.constant 1.000000e+00 : f32
    %cst_32 = arith.constant 0.000000e+00 : f32
    %107 = vector.broadcast %cst_31 : f32 to vector<16x16xf32>
    %108 = vector.broadcast %cst_32 : f32 to vector<16x16xf32>
    %109 = arith.select %106, %107, %108 : vector<16x16xi1>, vector<16x16xf32>
    %110 = tpu.concatenate %19, %25, %43, %49 in 1 : vector<16x16xf32>, vector<16x16xf32>, vector<16x16xf32>, vector<16x16xf32> -> vector<16x64xf32>
    %111 = arith.truncf %110 : vector<16x64xf32> to vector<16x64xbf16>
    %112 = tpu.concatenate %25, %31, %49, %55 in 1 : vector<16x16xf32>, vector<16x16xf32>, vector<16x16xf32>, vector<16x16xf32> -> vector<16x64xf32>
    %113 = arith.truncf %112 : vector<16x64xf32> to vector<16x64xbf16>
    %114 = tpu.concatenate %31, %37, %55, %61 in 1 : vector<16x16xf32>, vector<16x16xf32>, vector<16x16xf32>, vector<16x16xf32> -> vector<16x64xf32>
    %115 = arith.truncf %114 : vector<16x64xf32> to vector<16x64xbf16>
    %116 = tpu.concatenate %43, %49, %67, %73 in 1 : vector<16x16xf32>, vector<16x16xf32>, vector<16x16xf32>, vector<16x16xf32> -> vector<16x64xf32>
    %117 = arith.truncf %116 : vector<16x64xf32> to vector<16x64xbf16>
    %118 = tpu.concatenate %49, %55, %73, %79 in 1 : vector<16x16xf32>, vector<16x16xf32>, vector<16x16xf32>, vector<16x16xf32> -> vector<16x64xf32>
    %119 = arith.truncf %118 : vector<16x64xf32> to vector<16x64xbf16>
    %120 = tpu.concatenate %55, %61, %79, %85 in 1 : vector<16x16xf32>, vector<16x16xf32>, vector<16x16xf32>, vector<16x16xf32> -> vector<16x64xf32>
    %121 = arith.truncf %120 : vector<16x64xf32> to vector<16x64xbf16>
    %122 = tpu.concatenate %67, %73, %91, %97 in 1 : vector<16x16xf32>, vector<16x16xf32>, vector<16x16xf32>, vector<16x16xf32> -> vector<16x64xf32>
    %123 = arith.truncf %122 : vector<16x64xf32> to vector<16x64xbf16>
    %124 = tpu.concatenate %73, %79, %97, %103 in 1 : vector<16x16xf32>, vector<16x16xf32>, vector<16x16xf32>, vector<16x16xf32> -> vector<16x64xf32>
    %125 = arith.truncf %124 : vector<16x64xf32> to vector<16x64xbf16>
    %126 = tpu.concatenate %79, %85, %103, %109 in 1 : vector<16x16xf32>, vector<16x16xf32>, vector<16x16xf32>, vector<16x16xf32> -> vector<16x64xf32>
    %127 = arith.truncf %126 : vector<16x64xf32> to vector<16x64xbf16>
    %128 = tpu.concatenate %111, %113, %115, %117, %119, %121, %123, %125, %127 in 0 : vector<16x64xbf16>, vector<16x64xbf16>, vector<16x64xbf16>, vector<16x64xbf16>, vector<16x64xbf16>, vector<16x64xbf16>, vector<16x64xbf16>, vector<16x64xbf16>, vector<16x64xbf16> -> vector<144x64xbf16>
    %c0_33 = arith.constant 0 : index
    %c0_34 = arith.constant 0 : index
    %129 = vector.load %arg1[%c0_33, %c0_34] : memref<64x128xbf16, #tpu.memory_space<vmem>>, vector<64x128xbf16>
    %cst_35 = arith.constant dense<0.000000e+00> : vector<144x128xf32>
    %130 = tpu.matmul %128, %129, %cst_35 {dimension_numbers = #tpu.dot_dimension_numbers<[1], [0], [0], [1], [0, 0, 1, 1], [], []>} : vector<144x64xbf16>, vector<64x128xbf16>, vector<144x128xf32> -> vector<144x128xf32>
    %c0_36 = arith.constant 0 : index
    %c0_37 = arith.constant 0 : index
    %131 = vector.load %arg2[%c0_36, %c0_37] : memref<1x128xf32, #tpu.memory_space<vmem>>, vector<1x128xf32>
    %132 = vector.broadcast %131 : vector<1x128xf32> to vector<144x128xf32>
    %133 = arith.addf %130, %132 : vector<144x128xf32>
    %cst_38 = arith.constant 5.000000e-02 : f32
    %134 = vector.broadcast %cst_38 : f32 to vector<144x128xf32>
    %135 = arith.mulf %134, %133 : vector<144x128xf32>
    %136 = arith.maximumf %133, %135 : vector<144x128xf32>
    %c0_39 = arith.constant 0 : index
    %c0_40 = arith.constant 0 : index
    %137 = vector.load %arg3[%c0_39, %c0_40] : memref<1x128xf32, #tpu.memory_space<vmem>>, vector<1x128xf32>
    %c0_41 = arith.constant 0 : index
    %c0_42 = arith.constant 0 : index
    %138 = vector.load %arg4[%c0_41, %c0_42] : memref<1x128xf32, #tpu.memory_space<vmem>>, vector<1x128xf32>
    %139 = tpu.concatenate %4, %4, %4, %4, %4, %4, %4, %4, %4 in 0 : vector<16x1xf32>, vector<16x1xf32>, vector<16x1xf32>, vector<16x1xf32>, vector<16x1xf32>, vector<16x1xf32>, vector<16x1xf32>, vector<16x1xf32>, vector<16x1xf32> -> vector<144x1xf32>
    %140 = vector.broadcast %139 : vector<144x1xf32> to vector<144x128xf32>
    %141 = arith.mulf %136, %140 : vector<144x128xf32>
    %cst_43 = arith.constant dense<0.000000e+00> : vector<128xf32>
    %142 = vector.multi_reduction <add>, %141, %cst_43 [0] : vector<144x128xf32> to vector<128xf32>
    %143 = vector.shape_cast %142 : vector<128xf32> to vector<1x128xf32>
    %144 = arith.mulf %136, %136 : vector<144x128xf32>
    %145 = vector.broadcast %139 : vector<144x1xf32> to vector<144x128xf32>
    %146 = arith.mulf %144, %145 : vector<144x128xf32>
    %cst_44 = arith.constant dense<0.000000e+00> : vector<128xf32>
    %147 = vector.multi_reduction <add>, %146, %cst_44 [0] : vector<144x128xf32> to vector<128xf32>
    %148 = vector.shape_cast %147 : vector<128xf32> to vector<1x128xf32>
    %cst_45 = arith.constant 0.013888889 : f32
    %149 = vector.broadcast %cst_45 : f32 to vector<1x128xf32>
    %150 = arith.mulf %143, %149 : vector<1x128xf32>
    %cst_46 = arith.constant 0.013888889 : f32
    %151 = vector.broadcast %cst_46 : f32 to vector<1x128xf32>
    %152 = arith.mulf %148, %151 : vector<1x128xf32>
    %153 = arith.mulf %150, %150 : vector<1x128xf32>
    %154 = arith.subf %152, %153 : vector<1x128xf32>
    %cst_47 = arith.constant 0.000000e+00 : f32
    %155 = vector.broadcast %cst_47 : f32 to vector<1x128xf32>
    %156 = arith.maximumf %154, %155 : vector<1x128xf32>
    %cst_48 = arith.constant 9.99999974E-6 : f32
    %157 = vector.broadcast %cst_48 : f32 to vector<1x128xf32>
    %158 = arith.addf %156, %157 : vector<1x128xf32>
    %159 = math.rsqrt %158 : vector<1x128xf32>
    %160 = arith.mulf %159, %137 : vector<1x128xf32>
    %161 = arith.mulf %150, %160 : vector<1x128xf32>
    %162 = arith.subf %138, %161 : vector<1x128xf32>
    %163 = vector.broadcast %160 : vector<1x128xf32> to vector<144x128xf32>
    %164 = arith.mulf %136, %163 : vector<144x128xf32>
    %165 = vector.broadcast %162 : vector<1x128xf32> to vector<144x128xf32>
    %166 = arith.addf %164, %165 : vector<144x128xf32>
    %167 = arith.truncf %166 : vector<144x128xf32> to vector<144x128xbf16>
    %168 = vector.shape_cast %167 : vector<144x128xbf16> to vector<9x16x128xbf16>
    %169 = vector.extract_strided_slice %168 {offsets = [0, 0, 0], sizes = [1, 16, 128], strides = [1, 1, 1]} : vector<9x16x128xbf16> to vector<1x16x128xbf16>
    %170 = vector.shape_cast %169 : vector<1x16x128xbf16> to vector<16x128xbf16>
    %171 = vector.extract_strided_slice %168 {offsets = [1, 0, 0], sizes = [1, 16, 128], strides = [1, 1, 1]} : vector<9x16x128xbf16> to vector<1x16x128xbf16>
    %172 = vector.shape_cast %171 : vector<1x16x128xbf16> to vector<16x128xbf16>
    %173 = vector.extract_strided_slice %168 {offsets = [3, 0, 0], sizes = [1, 16, 128], strides = [1, 1, 1]} : vector<9x16x128xbf16> to vector<1x16x128xbf16>
    %174 = vector.shape_cast %173 : vector<1x16x128xbf16> to vector<16x128xbf16>
    %175 = vector.extract_strided_slice %168 {offsets = [4, 0, 0], sizes = [1, 16, 128], strides = [1, 1, 1]} : vector<9x16x128xbf16> to vector<1x16x128xbf16>
    %176 = vector.shape_cast %175 : vector<1x16x128xbf16> to vector<16x128xbf16>
    %177 = tpu.concatenate %170, %172, %174, %176 in 1 : vector<16x128xbf16>, vector<16x128xbf16>, vector<16x128xbf16>, vector<16x128xbf16> -> vector<16x512xbf16>
    %178 = vector.extract_strided_slice %168 {offsets = [1, 0, 0], sizes = [1, 16, 128], strides = [1, 1, 1]} : vector<9x16x128xbf16> to vector<1x16x128xbf16>
    %179 = vector.shape_cast %178 : vector<1x16x128xbf16> to vector<16x128xbf16>
    %180 = vector.extract_strided_slice %168 {offsets = [2, 0, 0], sizes = [1, 16, 128], strides = [1, 1, 1]} : vector<9x16x128xbf16> to vector<1x16x128xbf16>
    %181 = vector.shape_cast %180 : vector<1x16x128xbf16> to vector<16x128xbf16>
    %182 = vector.extract_strided_slice %168 {offsets = [4, 0, 0], sizes = [1, 16, 128], strides = [1, 1, 1]} : vector<9x16x128xbf16> to vector<1x16x128xbf16>
    %183 = vector.shape_cast %182 : vector<1x16x128xbf16> to vector<16x128xbf16>
    %184 = vector.extract_strided_slice %168 {offsets = [5, 0, 0], sizes = [1, 16, 128], strides = [1, 1, 1]} : vector<9x16x128xbf16> to vector<1x16x128xbf16>
    %185 = vector.shape_cast %184 : vector<1x16x128xbf16> to vector<16x128xbf16>
    %186 = tpu.concatenate %179, %181, %183, %185 in 1 : vector<16x128xbf16>, vector<16x128xbf16>, vector<16x128xbf16>, vector<16x128xbf16> -> vector<16x512xbf16>
    %187 = vector.extract_strided_slice %168 {offsets = [3, 0, 0], sizes = [1, 16, 128], strides = [1, 1, 1]} : vector<9x16x128xbf16> to vector<1x16x128xbf16>
    %188 = vector.shape_cast %187 : vector<1x16x128xbf16> to vector<16x128xbf16>
    %189 = vector.extract_strided_slice %168 {offsets = [4, 0, 0], sizes = [1, 16, 128], strides = [1, 1, 1]} : vector<9x16x128xbf16> to vector<1x16x128xbf16>
    %190 = vector.shape_cast %189 : vector<1x16x128xbf16> to vector<16x128xbf16>
    %191 = vector.extract_strided_slice %168 {offsets = [6, 0, 0], sizes = [1, 16, 128], strides = [1, 1, 1]} : vector<9x16x128xbf16> to vector<1x16x128xbf16>
    %192 = vector.shape_cast %191 : vector<1x16x128xbf16> to vector<16x128xbf16>
    %193 = vector.extract_strided_slice %168 {offsets = [7, 0, 0], sizes = [1, 16, 128], strides = [1, 1, 1]} : vector<9x16x128xbf16> to vector<1x16x128xbf16>
    %194 = vector.shape_cast %193 : vector<1x16x128xbf16> to vector<16x128xbf16>
    %195 = tpu.concatenate %188, %190, %192, %194 in 1 : vector<16x128xbf16>, vector<16x128xbf16>, vector<16x128xbf16>, vector<16x128xbf16> -> vector<16x512xbf16>
    %196 = vector.extract_strided_slice %168 {offsets = [4, 0, 0], sizes = [1, 16, 128], strides = [1, 1, 1]} : vector<9x16x128xbf16> to vector<1x16x128xbf16>
    %197 = vector.shape_cast %196 : vector<1x16x128xbf16> to vector<16x128xbf16>
    %198 = vector.extract_strided_slice %168 {offsets = [5, 0, 0], sizes = [1, 16, 128], strides = [1, 1, 1]} : vector<9x16x128xbf16> to vector<1x16x128xbf16>
    %199 = vector.shape_cast %198 : vector<1x16x128xbf16> to vector<16x128xbf16>
    %200 = vector.extract_strided_slice %168 {offsets = [7, 0, 0], sizes = [1, 16, 128], strides = [1, 1, 1]} : vector<9x16x128xbf16> to vector<1x16x128xbf16>
    %201 = vector.shape_cast %200 : vector<1x16x128xbf16> to vector<16x128xbf16>
    %202 = vector.extract_strided_slice %168 {offsets = [8, 0, 0], sizes = [1, 16, 128], strides = [1, 1, 1]} : vector<9x16x128xbf16> to vector<1x16x128xbf16>
    %203 = vector.shape_cast %202 : vector<1x16x128xbf16> to vector<16x128xbf16>
    %204 = tpu.concatenate %197, %199, %201, %203 in 1 : vector<16x128xbf16>, vector<16x128xbf16>, vector<16x128xbf16>, vector<16x128xbf16> -> vector<16x512xbf16>
    %205 = tpu.concatenate %177, %186, %195, %204 in 0 : vector<16x512xbf16>, vector<16x512xbf16>, vector<16x512xbf16>, vector<16x512xbf16> -> vector<64x512xbf16>
    %c0_49 = arith.constant 0 : index
    %c0_50 = arith.constant 0 : index
    %206 = vector.load %arg5[%c0_49, %c0_50] : memref<512x128xbf16, #tpu.memory_space<vmem>>, vector<512x128xbf16>
    %cst_51 = arith.constant dense<0.000000e+00> : vector<64x128xf32>
    %207 = tpu.matmul %205, %206, %cst_51 {dimension_numbers = #tpu.dot_dimension_numbers<[1], [0], [0], [1], [0, 0, 1, 1], [], []>} : vector<64x512xbf16>, vector<512x128xbf16>, vector<64x128xf32> -> vector<64x128xf32>
    %c0_52 = arith.constant 0 : index
    %c0_53 = arith.constant 0 : index
    %208 = vector.load %arg6[%c0_52, %c0_53] : memref<1x128xf32, #tpu.memory_space<vmem>>, vector<1x128xf32>
    %209 = vector.broadcast %208 : vector<1x128xf32> to vector<64x128xf32>
    %210 = arith.addf %207, %209 : vector<64x128xf32>
    %cst_54 = arith.constant 5.000000e-02 : f32
    %211 = vector.broadcast %cst_54 : f32 to vector<64x128xf32>
    %212 = arith.mulf %211, %210 : vector<64x128xf32>
    %213 = arith.maximumf %210, %212 : vector<64x128xf32>
    %c0_55 = arith.constant 0 : index
    %c0_56 = arith.constant 0 : index
    %214 = vector.load %arg7[%c0_55, %c0_56] : memref<1x128xf32, #tpu.memory_space<vmem>>, vector<1x128xf32>
    %c0_57 = arith.constant 0 : index
    %c0_58 = arith.constant 0 : index
    %215 = vector.load %arg8[%c0_57, %c0_58] : memref<1x128xf32, #tpu.memory_space<vmem>>, vector<1x128xf32>
    %216 = tpu.concatenate %4, %4, %4, %4 in 0 : vector<16x1xf32>, vector<16x1xf32>, vector<16x1xf32>, vector<16x1xf32> -> vector<64x1xf32>
    %217 = vector.broadcast %216 : vector<64x1xf32> to vector<64x128xf32>
    %218 = arith.mulf %213, %217 : vector<64x128xf32>
    %cst_59 = arith.constant dense<0.000000e+00> : vector<128xf32>
    %219 = vector.multi_reduction <add>, %218, %cst_59 [0] : vector<64x128xf32> to vector<128xf32>
    %220 = vector.shape_cast %219 : vector<128xf32> to vector<1x128xf32>
    %221 = arith.mulf %213, %213 : vector<64x128xf32>
    %222 = vector.broadcast %216 : vector<64x1xf32> to vector<64x128xf32>
    %223 = arith.mulf %221, %222 : vector<64x128xf32>
    %cst_60 = arith.constant dense<0.000000e+00> : vector<128xf32>
    %224 = vector.multi_reduction <add>, %223, %cst_60 [0] : vector<64x128xf32> to vector<128xf32>
    %225 = vector.shape_cast %224 : vector<128xf32> to vector<1x128xf32>
    %cst_61 = arith.constant 3.125000e-02 : f32
    %226 = vector.broadcast %cst_61 : f32 to vector<1x128xf32>
    %227 = arith.mulf %220, %226 : vector<1x128xf32>
    %cst_62 = arith.constant 3.125000e-02 : f32
    %228 = vector.broadcast %cst_62 : f32 to vector<1x128xf32>
    %229 = arith.mulf %225, %228 : vector<1x128xf32>
    %230 = arith.mulf %227, %227 : vector<1x128xf32>
    %231 = arith.subf %229, %230 : vector<1x128xf32>
    %cst_63 = arith.constant 0.000000e+00 : f32
    %232 = vector.broadcast %cst_63 : f32 to vector<1x128xf32>
    %233 = arith.maximumf %231, %232 : vector<1x128xf32>
    %cst_64 = arith.constant 9.99999974E-6 : f32
    %234 = vector.broadcast %cst_64 : f32 to vector<1x128xf32>
    %235 = arith.addf %233, %234 : vector<1x128xf32>
    %236 = math.rsqrt %235 : vector<1x128xf32>
    %237 = arith.mulf %236, %214 : vector<1x128xf32>
    %238 = arith.mulf %227, %237 : vector<1x128xf32>
    %239 = arith.subf %215, %238 : vector<1x128xf32>
    %240 = vector.broadcast %237 : vector<1x128xf32> to vector<64x128xf32>
    %241 = arith.mulf %213, %240 : vector<64x128xf32>
    %242 = vector.broadcast %239 : vector<1x128xf32> to vector<64x128xf32>
    %243 = arith.addf %241, %242 : vector<64x128xf32>
    %244 = arith.truncf %243 : vector<64x128xf32> to vector<64x128xbf16>
    %245 = vector.shape_cast %244 : vector<64x128xbf16> to vector<4x16x128xbf16>
    %246 = vector.extract_strided_slice %245 {offsets = [0, 0, 0], sizes = [1, 16, 128], strides = [1, 1, 1]} : vector<4x16x128xbf16> to vector<1x16x128xbf16>
    %247 = vector.shape_cast %246 : vector<1x16x128xbf16> to vector<16x128xbf16>
    %248 = vector.extract_strided_slice %245 {offsets = [1, 0, 0], sizes = [1, 16, 128], strides = [1, 1, 1]} : vector<4x16x128xbf16> to vector<1x16x128xbf16>
    %249 = vector.shape_cast %248 : vector<1x16x128xbf16> to vector<16x128xbf16>
    %250 = vector.extract_strided_slice %245 {offsets = [2, 0, 0], sizes = [1, 16, 128], strides = [1, 1, 1]} : vector<4x16x128xbf16> to vector<1x16x128xbf16>
    %251 = vector.shape_cast %250 : vector<1x16x128xbf16> to vector<16x128xbf16>
    %252 = vector.extract_strided_slice %245 {offsets = [3, 0, 0], sizes = [1, 16, 128], strides = [1, 1, 1]} : vector<4x16x128xbf16> to vector<1x16x128xbf16>
    %253 = vector.shape_cast %252 : vector<1x16x128xbf16> to vector<16x128xbf16>
    %254 = tpu.concatenate %247, %249, %251, %253 in 1 : vector<16x128xbf16>, vector<16x128xbf16>, vector<16x128xbf16>, vector<16x128xbf16> -> vector<16x512xbf16>
    %c0_65 = arith.constant 0 : index
    %c0_66 = arith.constant 0 : index
    %255 = vector.load %arg9[%c0_65, %c0_66] : memref<512x64xbf16, #tpu.memory_space<vmem>>, vector<512x64xbf16>
    %cst_67 = arith.constant dense<0.000000e+00> : vector<16x64xf32>
    %256 = tpu.matmul %254, %255, %cst_67 {dimension_numbers = #tpu.dot_dimension_numbers<[1], [0], [0], [1], [0, 0, 1, 1], [], []>} : vector<16x512xbf16>, vector<512x64xbf16>, vector<16x64xf32> -> vector<16x64xf32>
    %c0_68 = arith.constant 0 : index
    %c0_69 = arith.constant 0 : index
    %257 = vector.load %arg10[%c0_68, %c0_69] : memref<1x64xf32, #tpu.memory_space<vmem>>, vector<1x64xf32>
    %258 = vector.broadcast %257 : vector<1x64xf32> to vector<16x64xf32>
    %259 = arith.addf %256, %258 : vector<16x64xf32>
    %cst_70 = arith.constant 5.000000e-02 : f32
    %260 = vector.broadcast %cst_70 : f32 to vector<16x64xf32>
    %261 = arith.mulf %260, %259 : vector<16x64xf32>
    %262 = arith.maximumf %259, %261 : vector<16x64xf32>
    %263 = vector.broadcast %4 : vector<16x1xf32> to vector<16x64xf32>
    %264 = arith.mulf %262, %263 : vector<16x64xf32>
    %cst_71 = arith.constant dense<0.000000e+00> : vector<64xf32>
    %265 = vector.multi_reduction <add>, %264, %cst_71 [0] : vector<16x64xf32> to vector<64xf32>
    %266 = vector.shape_cast %265 : vector<64xf32> to vector<1x64xf32>
    %267 = arith.mulf %262, %262 : vector<16x64xf32>
    %268 = vector.broadcast %4 : vector<16x1xf32> to vector<16x64xf32>
    %269 = arith.mulf %267, %268 : vector<16x64xf32>
    %cst_72 = arith.constant dense<0.000000e+00> : vector<64xf32>
    %270 = vector.multi_reduction <add>, %269, %cst_72 [0] : vector<16x64xf32> to vector<64xf32>
    %271 = vector.shape_cast %270 : vector<64xf32> to vector<1x64xf32>
    %cst_73 = arith.constant 1.250000e-01 : f32
    %272 = vector.broadcast %cst_73 : f32 to vector<1x64xf32>
    %273 = arith.mulf %266, %272 : vector<1x64xf32>
    %cst_74 = arith.constant 1.250000e-01 : f32
    %274 = vector.broadcast %cst_74 : f32 to vector<1x64xf32>
    %275 = arith.mulf %271, %274 : vector<1x64xf32>
    %276 = arith.mulf %273, %273 : vector<1x64xf32>
    %277 = arith.subf %275, %276 : vector<1x64xf32>
    %cst_75 = arith.constant 0.000000e+00 : f32
    %278 = vector.broadcast %cst_75 : f32 to vector<1x64xf32>
    %279 = arith.maximumf %277, %278 : vector<1x64xf32>
    %cst_76 = arith.constant 9.99999974E-6 : f32
    %280 = vector.broadcast %cst_76 : f32 to vector<1x64xf32>
    %281 = arith.addf %279, %280 : vector<1x64xf32>
    %282 = math.rsqrt %281 : vector<1x64xf32>
    %c0_77 = arith.constant 0 : index
    %c0_78 = arith.constant 0 : index
    %283 = vector.load %arg11[%c0_77, %c0_78] : memref<1x64xf32, #tpu.memory_space<vmem>>, vector<1x64xf32>
    %284 = arith.mulf %282, %283 : vector<1x64xf32>
    %c0_79 = arith.constant 0 : index
    %c0_80 = arith.constant 0 : index
    %285 = vector.load %arg13[%c0_79, %c0_80] : memref<1x64xf32, #tpu.memory_space<vmem>>, vector<1x64xf32>
    %286 = arith.mulf %284, %285 : vector<1x64xf32>
    %c0_81 = arith.constant 0 : index
    %c0_82 = arith.constant 0 : index
    %287 = vector.load %arg12[%c0_81, %c0_82] : memref<1x64xf32, #tpu.memory_space<vmem>>, vector<1x64xf32>
    %c0_83 = arith.constant 0 : index
    %c0_84 = arith.constant 0 : index
    %288 = vector.load %arg13[%c0_83, %c0_84] : memref<1x64xf32, #tpu.memory_space<vmem>>, vector<1x64xf32>
    %289 = arith.mulf %287, %288 : vector<1x64xf32>
    %290 = arith.mulf %273, %286 : vector<1x64xf32>
    %291 = arith.subf %289, %290 : vector<1x64xf32>
    %cst_85 = arith.constant dense<0.000000e+00> : vector<1xf32>
    %292 = vector.multi_reduction <add>, %291, %cst_85 [1] : vector<1x64xf32> to vector<1xf32>
    %293 = vector.shape_cast %292 : vector<1xf32> to vector<1x1xf32>
    %c0_86 = arith.constant 0 : index
    %c0_87 = arith.constant 0 : index
    %294 = vector.load %arg14[%c0_86, %c0_87] : memref<1x1xf32, #tpu.memory_space<vmem>>, vector<1x1xf32>
    %295 = arith.addf %293, %294 : vector<1x1xf32>
    %296 = vector.broadcast %286 : vector<1x64xf32> to vector<16x64xf32>
    %297 = arith.mulf %262, %296 : vector<16x64xf32>
    %cst_88 = arith.constant dense<0.000000e+00> : vector<16xf32>
    %298 = vector.multi_reduction <add>, %297, %cst_88 [1] : vector<16x64xf32> to vector<16xf32>
    %299 = vector.shape_cast %298 : vector<16xf32> to vector<16x1xf32>
    %300 = vector.broadcast %295 : vector<1x1xf32> to vector<16x1xf32>
    %301 = arith.addf %299, %300 : vector<16x1xf32>
    %302 = math.exp %301 : vector<16x1xf32>
    %c0_89 = arith.constant 0 : index
    %c0_90 = arith.constant 0 : index
    %303 = vector.load %arg15[%c0_89, %c0_90] : memref<16x1xf32, #tpu.memory_space<vmem>>, vector<16x1xf32>
    tpu.vector_store %arg15[%c0_89, %c0_90], %302 {strides = array<i32>} : memref<16x1xf32, #tpu.memory_space<vmem>>, vector<16x1xf32>,
    return
  }
}

</mosaic_0001>

<bundles_post_ra>
// kernel: value_cnn_forward.1
= control target key start
LH: loop header
LB: loop body
LE: loop exit
PB: predicated region body
PF: predicated region fallthrough
CT: control target
= control target key end

     0   :  { %v2410_v0 = vmov 4   ;;  %v2411_v1 = vmov 1   ;;  %v2412_v5 = vmov 5   ;;  %v2413_v11 = vmov 2   ;;  %s2423_s22 = smov 32   ;;  %s2424_s23 = smov 16   ;;  %s3337_s0 = inlined_call_operand.vmem [shape: f32[16,16], index: 0, kind: input, shape index: {}]   ;;  %s3338_s1 = inlined_call_operand.vmem [shape: bf16[64,128], index: 1, kind: input, shape index: {}]   ;;  %s3339_s2 = inlined_call_operand.vmem [shape: f32[1,128], index: 2, kind: input, shape index: {}]   ;;  %s3340_s5 = inlined_call_operand.vmem [shape: bf16[512,128], index: 5, kind: input, shape index: {}]   ;;  %s3341_s3 = inlined_call_operand.vmem [shape: f32[1,128], index: 3, kind: input, shape index: {}]   ;;  %s3342_s4 = inlined_call_operand.vmem [shape: f32[1,128], index: 4, kind: input, shape index: {}]   ;;  %s3343_s6 = inlined_call_operand.vmem [shape: f32[1,128], index: 6, kind: input, shape index: {}]   ;;  %s3344_s10 = inlined_call_operand.vmem [shape: f32[1,64], index: 10, kind: input, shape index: {}]   ;;  %s3345_s9 = inlined_call_operand.vmem [shape: bf16[512,64], index: 9, kind: input, shape index: {}]   ;;  %s3346_s7 = inlined_call_operand.vmem [shape: f32[1,128], index: 7, kind: input, shape index: {}]   ;;  %s3347_s8 = inlined_call_operand.vmem [shape: f32[1,128], index: 8, kind: input, shape index: {}]   ;;  %s3348_s11 = inlined_call_operand.vmem [shape: f32[1,64], index: 11, kind: input, shape index: {}]   ;;  %s3349_s13 = inlined_call_operand.vmem [shape: f32[1,64], index: 13, kind: input, shape index: {}]   ;;  %s3350_s12 = inlined_call_operand.vmem [shape: f32[1,64], index: 12, kind: input, shape index: {}]   ;;  %s3351_s14 = inlined_call_operand.<no memory space> [shape: f32[1,1], index: 14, kind: input, shape index: {}]   ;;  %s3352_s15 = inlined_call_operand.vmem [shape: f32[16,1], index: 15, kind: output, shape index: {}]  }
   0x1   :  { %2228 = vset.pattern.permute.xlu1 %v2410_v0  ;;  %2227 = vset.pattern.permute.xlu0 %v2411_v1  ;;  %v62_v2 = vld [vmem:[%s3337_s0] sm:$0xff]  ;;  %v63_v3 = vld [vmem:[%s3337_s0 + $0x8] sm:$0xff]  ;;  %v2414_v12 = vmov 6   ;;  %v2415_v13 = vmov 3   ;;  %v2416_v14 = vmov 7   ;;  %v2417_v15 = vmov 0  }
   0x2   :  { %v64_v4 = vadd.f32 1.0, %v62_v2  ;;  %2229 = vset.pattern.permute.xlu2 %v2412_v5  ;;  %v65_v7 = vadd.f32 1.0, %v63_v3  ;;  %v2418_v16 = vmov 8   ;;  %v2419_v17 = vmov 9   ;;  %s2421_s0 = smov 48   ;;  %v2141_v59 = vld [vmem:[%s3338_s1 + $0x18] sm:$0xff] }
   0x3   :  { %v72_v18 = vlaneseq  ;;  %v2420_v21 = vmov 0.0   ;;  %v2422_v28 = vmov 10   ;;  %v2425_v57 = vmov 11   ;;  %614 = vmatpush.bf16.msra.mxu0 %v2141_v59  ;;  %v2140_v60 = vld [vmem:[%s3338_s1 + $0x10] sm:$0xff]  ;;  %v2139_v62 = vld [vmem:[%s3338_s1 + $0x8] sm:$0xff]  ;;  %v2138_v63 = vld [vmem:[%s3338_s1] sm:$0xff] }
   0x4   :  { %v68_v6 = vshra.s32 %v64_v4, 23  ;;  %v69_v9 = vshra.s32 %v65_v7, 23  ;;  %v2426_v58 = vmov 12   ;;  %v2427_v2 = vmov 13  }
   0x5   :  { %v2541_v20 = vand.u32 127, %v72_v18 }
   0x6   :  { %v2517_v8 = vadd.s32 4294967169, %v68_v6  ;;  %v2522_v10 = vadd.s32 4294967169, %v69_v9 }
   0x7   :  { %615 = vmatpush.bf16.msra.mxu0 %v2140_v60 }
   0x8   :  { %115 = vperm.xlu1 %2228, %v2517_v8   ;;  %85 = vperm.xlu0 %2227, %v2517_v8  }
   0x9   :  { %125 = vperm.xlu2 %2229, %v2517_v8  }
   0xb   :  { %616 = vmatpush.bf16.msra.mxu0 %v2139_v62 }
   0xf   :  { %617 = vmatpush.bf16.msra.mxu0 %v2138_v63 }
  0x10   :  { %118 = vperm.xlu1 %2228, %v2522_v10   ;;  %88 = vperm.xlu0 %2227, %v2522_v10  }
  0x11   :  { %128 = vperm.xlu2 %2229, %v2522_v10  }
  0x18   :  { %2231 = vset.pattern.permute.xlu1 %v2413_v11  ;;  %2230 = vset.pattern.permute.xlu0 %v2413_v11 }
  0x19   :  { %98 = vperm.xlu1 %2231, %v2522_v10   ;;  %95 = vperm.xlu0 %2230, %v2517_v8  }
  0x1a   :  { %2232 = vset.pattern.permute.xlu2 %v2414_v12 }
  0x1b   :  { %135 = vperm.xlu2 %2232, %v2517_v8  }
  0x21   :  { %2233 = vset.pattern.permute.xlu1 %v2414_v12  ;;  %2235 = vset.pattern.permute.xlu0 %v2415_v13 }
  0x22   :  { %138 = vperm.xlu1 %2233, %v2522_v10   ;;  %108 = vperm.xlu0 %2235, %v2522_v10  }
  0x23   :  { %2234 = vset.pattern.permute.xlu2 %v2415_v13 }
  0x24   :  { %105 = vperm.xlu2 %2234, %v2517_v8  }
  0x2a   :  { %2236 = vset.pattern.permute.xlu1 %v2416_v14  ;;  %2245 = vset.pattern.permute.xlu0 %v2418_v16 }
  0x2b   :  { %145 = vperm.xlu1 %2236, %v2517_v8  }
  0x2c   :  { %2237 = vset.pattern.permute.xlu2 %v2416_v14 }
  0x2d   :  { %148 = vperm.xlu2 %2237, %v2522_v10  }
  0x33   :  { %2238 = vset.pattern.permute.xlu1 %v2417_v15 }
  0x34   :  { %75 = vperm.xlu1 %2238, %v2517_v8  }
  0x35   :  { %2239 = vset.pattern.permute.xlu2 %v2417_v15 }
  0x36   :  { %78 = vperm.xlu2 %2239, %v2522_v10  }
  0x3c   :  { %2246 = vset.pattern.permute.xlu1 %v2418_v16 }
  0x3d   :  { %158 = vperm.xlu1 %2246, %v2522_v10  }
  0x3e   :  { %2247 = vset.pattern.permute.xlu2 %v2419_v17 }
  0x3f   :  { %165 = vperm.xlu2 %2247, %v2517_v8  }
  0x45   :  { %2253 = vset.pattern.permute.xlu1 %v2419_v17 }
  0x47   :  { %2264 = vset.pattern.permute.xlu2 %v2422_v28 }
  0x63   :  { %v126_v19 = vpop.permute.xlu2 %125 }
  0x64   :  { %vm130_vm0 = vcmp.eq.s32.totalorder %v126_v19, %v2541_v20 }
  0x65   :  { %v2545_v22 = vsel %vm130_vm0, 1.0, %v2420_v21  ;;  %vm261_vm0 = vcmask 261120  }
  0x6b   :  { %v129_v23 = vpop.permute.xlu2 %128 }
  0x6c   :  { %vm131_vm1 = vcmp.eq.s32.totalorder %v129_v23, %v2541_v20 }
  0x6d   :  { %v2549_v24 = vsel %vm131_vm1, 1.0, %v2420_v21  ;;  %vm258_vm1 = vcmask 130048  }
  0x6e   :  { %v2553_v25 = vpack.i.bf16 %v2549_v24, %v2545_v22 }
  0x70   :  { %2255 = vrot.lane.b32.xlu2 %v2553_v25, %s2421_s0 }
  0x75   :  { %v136_v37 = vpop.permute.xlu2 %135 }
  0x76   :  { %vm140_vm8 = vcmp.eq.s32.totalorder %v136_v37, %v2541_v20 }
  0x77   :  { %v2594_v44 = vsel %vm140_vm8, 1.0, %v2420_v21 }
  0x7a   :  { %v116_v26 = vpop.permute.xlu1 %115  ;;  %v86_v27 = vpop.permute.xlu0 %85 }
  0x7b   :  { %vm90_vm2 = vcmp.eq.s32.totalorder %v86_v27, %v2541_v20  ;;  %vm120_vm3 = vcmp.eq.s32.totalorder %v116_v26, %v2541_v20 }
  0x7c   :  { %v2560_v29 = vsel %vm90_vm2, 1.0, %v2420_v21  ;;  %v2565_v32 = vsel %vm120_vm3, 1.0, %v2420_v21  ;;  %vm264_vm2 = vcmask 392192  }
  0x7e   :  { %v106_v43 = vpop.permute.xlu2 %105 }
  0x7f   :  { %vm110_vm10 = vcmp.eq.s32.totalorder %v106_v43, %v2541_v20 }
  0x80   :  { %v112_v50 = vsel %vm110_vm10, 1.0, %v2420_v21 }
  0x82   :  { %v119_v30 = vpop.permute.xlu1 %118  ;;  %v89_v31 = vpop.permute.xlu0 %88 }
  0x83   :  { %vm121_vm4 = vcmp.eq.s32.totalorder %v119_v30, %v2541_v20  ;;  %vm91_vm5 = vcmp.eq.s32.totalorder %v89_v31, %v2541_v20 }
  0x84   :  { %v2568_v33 = vsel %vm121_vm4, 1.0, %v2420_v21  ;;  %v2571_v34 = vsel %vm91_vm5, 1.0, %v2420_v21 }
  0x85   :  { %v2248_v35 = vpack.i.bf16 %v2568_v33, %v2565_v32  ;;  %v2240_v36 = vpack.i.bf16 %v2571_v34, %v2560_v29 }
  0x87   :  { %2249 = vrot.lane.b32.xlu1 %v2248_v35, %s2423_s22  ;;  %2241 = vrot.lane.b32.xlu0 %v2240_v36, %s2424_s23  ;;  %v149_v49 = vpop.permute.xlu2 %148 }
  0x88   :  { %vm151_vm12 = vcmp.eq.s32.totalorder %v149_v49, %v2541_v20 }
  0x89   :  { %v153_v54 = vsel %vm151_vm12, 1.0, %v2420_v21 }
  0x8b   :  { %v99_v38 = vpop.permute.xlu1 %98  ;;  %v96_v39 = vpop.permute.xlu0 %95 }
  0x8c   :  { %vm101_vm6 = vcmp.eq.s32.totalorder %v99_v38, %v2541_v20  ;;  %vm100_vm7 = vcmp.eq.s32.totalorder %v96_v39, %v2541_v20 }
  0x8d   :  { %v2582_v40 = vsel %vm101_vm6, 1.0, %v2420_v21  ;;  %v2585_v41 = vsel %vm100_vm7, 1.0, %v2420_v21  ;;  %vm582_vm7 = vcmask 523264  }
  0x8e   :  { %v2259_v42 = vpack.i.bf16 %v2582_v40, %v2585_v41 }
  0x8f   :  { %168 = vperm.xlu1 %2253, %v2522_v10   ;;  %155 = vperm.xlu0 %2245, %v2517_v8  }
  0x90   :  { %2260 = vrot.lane.b32.xlu2 %v2259_v42, %s2424_s23  ;;  %v79_v61 = vpop.permute.xlu2 %78 }
  0x91   :  { %vm81_vm14 = vcmp.eq.s32.totalorder %v79_v61, %v2541_v20 }
  0x92   :  { %v83_v5 = vsel %vm81_vm14, 1.0, %v2420_v21 }
  0x94   :  { %v139_v45 = vpop.permute.xlu1 %138  ;;  %v109_v46 = vpop.permute.xlu0 %108 }
  0x95   :  { %vm141_vm9 = vcmp.eq.s32.totalorder %v139_v45, %v2541_v20  ;;  %vm111_vm11 = vcmp.eq.s32.totalorder %v109_v46, %v2541_v20 }
  0x96   :  { %v2598_v47 = vsel %vm141_vm9, 1.0, %v2420_v21  ;;  %v113_v51 = vsel %vm111_vm11, 1.0, %v2420_v21 }
  0x97   :  { %2266 = vrot.lane.b32.xlu0 %v2553_v25, %s2423_s22  ;;  %v2604_v48 = vpack.i.bf16 %v2598_v47, %v2594_v44  ;;  %v2278_v52 = vpack.i.bf16 %v113_v51, %v112_v50  ;;  %2310 = vset.pattern.permute.xlu1 %v2427_v2 }
  0x98   :  { %2270 = vset.pattern.permute.xlu0 %v2422_v28  ;;  %175 = vperm.xlu2 %2264, %v2517_v8  }
  0x99   :  { %2274 = vrot.lane.b32.xlu1 %v2604_v48, %s2421_s0  ;;  %v166_v1 = vpop.permute.xlu2 %165 }
  0x9a   :  { %vm170_vm3 = vcmp.eq.s32.totalorder %v166_v1, %v2541_v20 }
  0x9b   :  { %v2656_v35 = vsel %vm170_vm3, 1.0, %v2420_v21 }
  0x9d   :  { %v146_v53 = vpop.permute.xlu1 %145 }
  0x9e   :  { %vm150_vm13 = vcmp.eq.s32.totalorder %v146_v53, %v2541_v20 }
  0x9f   :  { %178 = vperm.xlu0 %2270, %v2522_v10   ;;  %v152_v55 = vsel %vm150_vm13, 1.0, %v2420_v21 }
  0xa0   :  { %v2618_v56 = vpack.i.bf16 %v153_v54, %v152_v55  ;;  %2271 = vset.pattern.permute.xlu2 %v2425_v57  ;;  %v2428_v54 = vmov 15  }
  0xa1   :  { %2279 = vrot.lane.b32.xlu1 %v2278_v52, %s2424_s23  ;;  %185 = vperm.xlu2 %2271, %v2517_v8  }
  0xa6   :  { %v76_v0 = vpop.permute.xlu1 %75 }
  0xa7   :  { %2272 = vset.pattern.permute.xlu0 %v2425_v57  ;;  %vm80_vm15 = vcmp.eq.s32.totalorder %v76_v0, %v2541_v20 }
  0xa8   :  { %188 = vperm.xlu0 %2272, %v2522_v10   ;;  %v82_v18 = vsel %vm80_vm15, 1.0, %v2420_v21 }
  0xa9   :  { %2291 = vrot.lane.b32.xlu1 %v2618_v56, %s2421_s0  ;;  %2284 = vrot.lane.b32.xlu2 %v2604_v48, %s2423_s22 }
  0xaa   :  { %2288 = vset.pattern.permute.xlu2 %v2426_v58 }
  0xaf   :  { %v159_v3 = vpop.permute.xlu1 %158 }
  0xb0   :  { %2289 = vset.pattern.permute.xlu0 %v2426_v58  ;;  %vm161_vm4 = vcmp.eq.s32.totalorder %v159_v3, %v2541_v20 }
  0xb1   :  { %2296 = vrot.lane.b32.xlu1 %v2553_v25, %s2424_s23  ;;  %198 = vperm.xlu0 %2289, %v2522_v10   ;;  %v2661_v43 = vsel %vm161_vm4, 1.0, %v2420_v21 }
  0xb2   :  { %195 = vperm.xlu2 %2288, %v2517_v8  }
  0xb9   :  { %2344 = vset.pattern.permute.xlu0 %v2428_v54 }
  0xba   :  { %2311 = vset.pattern.permute.xlu2 %v2427_v2 }
  0xca   :  { %v2256_v4 = vpop.permute.xlu2 %2255 }
  0xcb   :  { %v2258_v6 = vunpack.i.h.bf16 %v2256_v4  ;;  %v2257_v7 = vunpack.i.l.bf16 %v2256_v4 }
  0xea   :  { %v2261_v12 = vpop.permute.xlu2 %2260 }
  0xeb   :  { %v2263_v52 = vunpack.i.h.bf16 %v2261_v12  ;;  %v2262_v53 = vunpack.i.l.bf16 %v2261_v12 }
  0xed   :  { %v292_v59 = vsel %vm258_vm1, %v2571_v34, %v2263_v52  ;;  %v291_v60 = vsel %vm258_vm1, %v2560_v29, %v2262_v53 }
  0xf2   :  { %v176_v42 = vpop.permute.xlu2 %175 }
  0xf3   :  { %vm180_vm8 = vcmp.eq.s32.totalorder %v176_v42, %v2541_v20 }
  0xf9   :  { %v2250_v9 = vpop.permute.xlu1 %2249  ;;  %v2242_v11 = vpop.permute.xlu0 %2241 }
  0xfa   :  { %v2252_v13 = vunpack.i.h.bf16 %v2250_v9  ;;  %v2251_v14 = vunpack.i.l.bf16 %v2250_v9  ;;  %v2244_v16 = vunpack.i.h.bf16 %v2242_v11  ;;  %v2243_v17 = vunpack.i.l.bf16 %v2242_v11 }
  0xfb   :  { %v186_v2 = vpop.permute.xlu2 %185 }
  0xfc   :  { %v260_v19 = vsel %vm258_vm1, %v83_v5, %v2244_v16  ;;  %v259_v23 = vsel %vm258_vm1, %v82_v18, %v2243_v17  ;;  %v2692_v5 = vsel %vm180_vm8, 1.0, %v2420_v21  ;;  %vm190_vm10 = vcmp.eq.s32.totalorder %v186_v2, %v2541_v20 }
  0xfd   :  { %v263_v25 = vsel %vm261_vm0, %v260_v19, %v2252_v13  ;;  %v262_v26 = vsel %vm261_vm0, %v259_v23, %v2251_v14  ;;  %v2429_v19 = vmov 14  }
  0xfe   :  { %v265_v27 = vsel %vm264_vm2, %v262_v26, %v2257_v7  ;;  %v266_v28 = vsel %vm264_vm2, %v263_v25, %v2258_v6 }
  0xff   :  { %v267_v30 = vpack.c.bf16 %v265_v27, %v265_v27  ;;  %v268_v31 = vpack.c.bf16 %v266_v28, %v266_v28 }
 0x101   :  { %v169_v36 = vpop.permute.xlu1 %168  ;;  %v156_v37 = vpop.permute.xlu0 %155  ;;  %v503_v38 = vunpack.c.l.b16 %v267_v30  ;;  %v504_v39 = vunpack.c.l.b16 %v268_v31 }
 0x102   :  { %vm171_vm5 = vcmp.eq.s32.totalorder %v169_v36, %v2541_v20  ;;  %vm160_vm6 = vcmp.eq.s32.totalorder %v156_v37, %v2541_v20 }
 0x103   :  { %v2664_v45 = vsel %vm171_vm5, 1.0, %v2420_v21  ;;  %v2667_v46 = vsel %vm160_vm6, 1.0, %v2420_v21  ;;  %v505_v49 = vpack.c.b16 %v504_v39, %v503_v38  ;;  %v2285_v18 = vpop.permute.xlu2 %2284 }
 0x104   :  { %v2300_v50 = vpack.i.bf16 %v2661_v43, %v2667_v46  ;;  %v2673_v51 = vpack.i.bf16 %v2664_v45, %v2656_v35  ;;  %v2287_v23 = vunpack.i.h.bf16 %v2285_v18  ;;  %v2286_v25 = vunpack.i.l.bf16 %v2285_v18 }
 0x105   :  { %1873 = vmatmul.msk.bf16.vlgmr.msra.gmra.mxu0 %vm582_vm7, %v505_v49 }
 0x106   :  { %2306 = vrot.lane.b32.xlu1 %v2673_v51, %s2421_s0  ;;  %2301 = vrot.lane.b32.xlu2 %v2300_v50, %s2423_s22 }
 0x109   :  { %v2267_v55 = vpop.permute.xlu0 %2266 }
 0x10a   :  { %v2269_v57 = vunpack.i.h.bf16 %v2267_v55  ;;  %v2268_v58 = vunpack.i.l.bf16 %v2267_v55 }
 0x10b   :  { %v2275_v61 = vpop.permute.xlu1 %2274 }
 0x10c   :  { %v294_v62 = vsel %vm261_vm0, %v292_v59, %v2269_v57  ;;  %v293_v63 = vsel %vm261_vm0, %v291_v60, %v2268_v58  ;;  %v2277_v0 = vunpack.i.h.bf16 %v2275_v61  ;;  %v2276_v1 = vunpack.i.l.bf16 %v2275_v61  ;;  %v196_v57 = vpop.permute.xlu2 %195 }
 0x10d   :  { %vm200_vm12 = vcmp.eq.s32.totalorder %v196_v57, %v2541_v20 }
 0x10e   :  { %v295_v3 = vsel %vm264_vm2, %v293_v63, %v2276_v1  ;;  %v296_v4 = vsel %vm264_vm2, %v294_v62, %v2277_v0  ;;  %205 = vperm.xlu1 %2310, %v2517_v8   ;;  %208 = vperm.xlu2 %2311, %v2522_v10   ;;  %v202_v58 = vsel %vm200_vm12, 1.0, %v2420_v21 }
 0x10f   :  { %v297_v34 = vpack.c.bf16 %v295_v3, %v295_v3  ;;  %v298_v29 = vpack.c.bf16 %v296_v4, %v296_v4 }
 0x111   :  { %v179_v6 = vpop.permute.xlu0 %178  ;;  %v508_v7 = vunpack.c.l.b16 %v297_v34  ;;  %v509_v9 = vunpack.c.l.b16 %v298_v29 }
 0x112   :  { %vm181_vm9 = vcmp.eq.s32.totalorder %v179_v6, %v2541_v20 }
 0x113   :  { %v2696_v11 = vsel %vm181_vm9, 1.0, %v2420_v21  ;;  %v2280_v12 = vpop.permute.xlu1 %2279  ;;  %v510_v13 = vpack.c.b16 %v509_v9, %v508_v7 }
 0x114   :  { %v2322_v14 = vpack.i.bf16 %v2696_v11, %v2692_v5  ;;  %v2282_v16 = vunpack.i.h.bf16 %v2280_v12  ;;  %v2281_v17 = vunpack.i.l.bf16 %v2280_v12 }
 0x115   :  { %1874 = vmatmul.msk.bf16.gmra.mxu0 %vm582_vm7, %v510_v13 }
 0x116   :  { %2313 = vrot.lane.b32.xlu1 %v2604_v48, %s2424_s23  ;;  %2318 = vrot.lane.b32.xlu2 %v2673_v51, %s2423_s22  ;;  %v322_v26 = vsel %vm258_vm1, %v2582_v40, %v2282_v16  ;;  %v321_v27 = vsel %vm258_vm1, %v2585_v41, %v2281_v17  ;;  %v192_v40 = vsel %vm190_vm10, 1.0, %v2420_v21 }
 0x117   :  { %2323 = vrot.lane.b32.xlu0 %v2322_v14, %s2421_s0  ;;  %2327 = vset.pattern.permute.xlu1 %v2429_v19  ;;  %v323_v36 = vsel %vm261_vm0, %v321_v27, %v2286_v25  ;;  %v324_v37 = vsel %vm261_vm0, %v322_v26, %v2287_v23 }
 0x118   :  { %2328 = vset.pattern.permute.xlu2 %v2429_v19 }
 0x11a   :  { %v189_v28 = vpop.permute.xlu0 %188 }
 0x11b   :  { %v2292_v30 = vpop.permute.xlu1 %2291  ;;  %vm191_vm11 = vcmp.eq.s32.totalorder %v189_v28, %v2541_v20 }
 0x11c   :  { %v2294_v48 = vunpack.i.h.bf16 %v2292_v30  ;;  %v2293_v31 = vunpack.i.l.bf16 %v2292_v30  ;;  %v193_v41 = vsel %vm191_vm11, 1.0, %v2420_v21 }
 0x11d   :  { %v2339_v53 = vpack.i.bf16 %v193_v41, %v192_v40 }
 0x11e   :  { %v325_v38 = vsel %vm264_vm2, %v323_v36, %v2293_v31  ;;  %v326_v39 = vsel %vm264_vm2, %v324_v37, %v2294_v48  ;;  %215 = vperm.xlu1 %2327, %v2517_v8   ;;  %218 = vperm.xlu2 %2328, %v2522_v10  }
 0x11f   :  { %2330 = vrot.lane.b32.xlu0 %v2618_v56, %s2424_s23  ;;  %v327_v42 = vpack.c.bf16 %v325_v38, %v325_v38  ;;  %v328_v49 = vpack.c.bf16 %v326_v39, %v326_v39 }
 0x121   :  { %v513_v50 = vunpack.c.l.b16 %v327_v42  ;;  %v514_v52 = vunpack.c.l.b16 %v328_v49 }
 0x123   :  { %v515_v55 = vpack.c.b16 %v514_v52, %v513_v50  ;;  %v199_v56 = vpop.permute.xlu0 %198 }
 0x124   :  { %vm201_vm13 = vcmp.eq.s32.totalorder %v199_v56, %v2541_v20 }
 0x125   :  { %1875 = vmatmul.msk.bf16.gmra.mxu0 %vm582_vm7, %v515_v55  ;;  %v203_v59 = vsel %vm201_vm13, 1.0, %v2420_v21 }
 0x126   :  { %2335 = vrot.lane.b32.xlu1 %v2322_v14, %s2423_s22  ;;  %2340 = vrot.lane.b32.xlu2 %v2339_v53, %s2421_s0 }
 0x127   :  { %225 = vperm.xlu0 %2344, %v2517_v8   ;;  %2345 = vset.pattern.permute.xlu1 %v2428_v54  ;;  %v2351_v8 = vpack.i.bf16 %v203_v59, %v202_v58  ;;  %v2430_v54 = vmov 1.0|0.0  }
 0x12e   :  { %228 = vperm.xlu1 %2345, %v2522_v10   ;;  %2347 = vrot.lane.b32.xlu2 %v2673_v51, %s2424_s23  ;;  %v2297_v10 = vpop.permute.xlu1 %2296 }
 0x12f   :  { %2362 = vrot.lane.b32.xlu0 %v2322_v14, %s2424_s23  ;;  %v2299_v61 = vunpack.i.h.bf16 %v2297_v10  ;;  %v2298_v62 = vunpack.i.l.bf16 %v2297_v10 }
 0x130   :  { %2391 = vset.pattern.permute.xlu0 %v2417_v15 }
 0x131   :  { %v352_v2 = vsel %vm258_vm1, %v2568_v33, %v2299_v61  ;;  %v351_v15 = vsel %vm258_vm1, %v2565_v32, %v2298_v62 }
 0x136   :  { %2352 = vrot.lane.b32.xlu1 %v2351_v8, %s2423_s22 }
 0x137   :  { %2377 = vrot.lane.b32.xlu0 %v2339_v53, %s2424_s23 }
 0x13f   :  { %2393 = vperm.xlu0 %2391, %v2430_v54  }
 0x160   :  { %v2302_v60 = vpop.permute.xlu2 %2301 }
 0x161   :  { %v2304_v51 = vunpack.i.h.bf16 %v2302_v60  ;;  %v2303_v63 = vunpack.i.l.bf16 %v2302_v60 }
 0x163   :  { %v354_v34 = vsel %vm261_vm0, %v352_v2, %v2304_v51  ;;  %v353_v29 = vsel %vm261_vm0, %v351_v15, %v2303_v63 }
 0x168   :  { %v209_v0 = vpop.permute.xlu2 %208 }
 0x169   :  { %vm211_vm14 = vcmp.eq.s32.totalorder %v209_v0, %v2541_v20 }
 0x16a   :  { %v213_v33 = vsel %vm211_vm14, 1.0, %v2420_v21  ;;  %vm1826_vm14 = vcmask 516096  }
 0x170   :  { %v2319_v17 = vpop.permute.xlu2 %2318 }
 0x171   :  { %v2321_v28 = vunpack.i.h.bf16 %v2319_v17  ;;  %v2320_v30 = vunpack.i.l.bf16 %v2319_v17 }
 0x178   :  { %v2307_v1 = vpop.permute.xlu1 %2306  ;;  %v219_v38 = vpop.permute.xlu2 %218 }
 0x179   :  { %v2309_v3 = vunpack.i.h.bf16 %v2307_v1  ;;  %v2308_v4 = vunpack.i.l.bf16 %v2307_v1  ;;  %vm221_vm3 = vcmp.eq.s32.totalorder %v219_v38, %v2541_v20 }
 0x17a   :  { %v223_v52 = vsel %vm221_vm3, 1.0, %v2420_v21 }
 0x17b   :  { %v355_v6 = vsel %vm264_vm2, %v353_v29, %v2308_v4  ;;  %v356_v7 = vsel %vm264_vm2, %v354_v34, %v2309_v3 }
 0x17c   :  { %v357_v9 = vpack.c.bf16 %v355_v6, %v355_v6  ;;  %v358_v12 = vpack.c.bf16 %v356_v7, %v356_v7 }
 0x17e   :  { %v518_v13 = vunpack.c.l.b16 %v357_v9  ;;  %v519_v14 = vunpack.c.l.b16 %v358_v12 }
 0x180   :  { %v206_v16 = vpop.permute.xlu1 %205  ;;  %v520_v32 = vpack.c.b16 %v519_v14, %v518_v13  ;;  %v2341_v54 = vpop.permute.xlu2 %2340 }
 0x181   :  { %vm210_vm15 = vcmp.eq.s32.totalorder %v206_v16, %v2541_v20  ;;  %v2343_v60 = vunpack.i.h.bf16 %v2341_v54  ;;  %v2342_v10 = vunpack.i.l.bf16 %v2341_v54 }
 0x182   :  { %v212_v18 = vsel %vm210_vm15, 1.0, %v2420_v21  ;;  %1876 = vmatmul.msk.bf16.gmra.mxu0 %vm582_vm7, %v520_v32 }
 0x183   :  { %v2366_v19 = vpack.i.bf16 %v213_v33, %v212_v18 }
 0x185   :  { %2357 = vrot.lane.b32.xlu2 %v2366_v19, %s2421_s0  ;;  %2367 = vrot.lane.b32.xlu1 %v2366_v19, %s2423_s22 }
 0x188   :  { %v2314_v23 = vpop.permute.xlu1 %2313  ;;  %v2348_v14 = vpop.permute.xlu2 %2347 }
 0x189   :  { %v2316_v25 = vunpack.i.h.bf16 %v2314_v23  ;;  %v2315_v26 = vunpack.i.l.bf16 %v2314_v23  ;;  %v2324_v27 = vpop.permute.xlu0 %2323  ;;  %v2350_v16 = vunpack.i.h.bf16 %v2348_v14  ;;  %v2349_v32 = vunpack.i.l.bf16 %v2348_v14 }
 0x18a   :  { %v2326_v48 = vunpack.i.h.bf16 %v2324_v27  ;;  %v2325_v31 = vunpack.i.l.bf16 %v2324_v27 }
 0x18b   :  { %v380_v36 = vsel %vm258_vm1, %v2549_v24, %v2316_v25  ;;  %v379_v37 = vsel %vm258_vm1, %v2545_v22, %v2315_v26  ;;  %v438_v23 = vsel %vm258_vm1, %v2661_v43, %v2350_v16 }
 0x18c   :  { %v381_v39 = vsel %vm261_vm0, %v379_v37, %v2320_v30  ;;  %v382_v40 = vsel %vm261_vm0, %v380_v36, %v2321_v28 }
 0x18d   :  { %v384_v41 = vsel %vm264_vm2, %v382_v40, %v2326_v48  ;;  %v383_v42 = vsel %vm264_vm2, %v381_v39, %v2325_v31 }
 0x18e   :  { %v385_v49 = vpack.c.bf16 %v383_v42, %v383_v42  ;;  %v386_v50 = vpack.c.bf16 %v384_v41, %v384_v41 }
 0x190   :  { %v216_v53 = vpop.permute.xlu1 %215  ;;  %v523_v24 = vunpack.c.l.b16 %v385_v49  ;;  %v524_v55 = vunpack.c.l.b16 %v386_v50 }
 0x191   :  { %vm220_vm4 = vcmp.eq.s32.totalorder %v216_v53, %v2541_v20  ;;  %v2331_v57 = vpop.permute.xlu0 %2330 }
 0x192   :  { %v222_v22 = vsel %vm220_vm4, 1.0, %v2420_v21  ;;  %v525_v56 = vpack.c.b16 %v524_v55, %v523_v24  ;;  %v2333_v59 = vunpack.i.h.bf16 %v2331_v57  ;;  %v2332_v8 = vunpack.i.l.bf16 %v2331_v57  ;;  %v619_v57 = vpop.f32.mrf.mxu0 }
 0x193   :  { %v2381_v58 = vpack.i.bf16 %v223_v52, %v222_v22 }
 0x194   :  { %1877 = vmatmul.msk.bf16.gmra.mxu0 %vm582_vm7, %v525_v56  ;;  %v408_v63 = vsel %vm258_vm1, %v2598_v47, %v2333_v59  ;;  %v407_v0 = vsel %vm258_vm1, %v2594_v44, %v2332_v8 }
 0x195   :  { %2372 = vrot.lane.b32.xlu2 %v2381_v58, %s2421_s0  ;;  %2382 = vrot.lane.b32.xlu1 %v2381_v58, %s2423_s22 }
 0x198   :  { %v2336_v61 = vpop.permute.xlu1 %2335 }
 0x199   :  { %v2338_v62 = vunpack.i.h.bf16 %v2336_v61  ;;  %v2337_v51 = vunpack.i.l.bf16 %v2336_v61  ;;  %v226_v15 = vpop.permute.xlu0 %225 }
 0x19a   :  { %vm230_vm5 = vcmp.eq.s32.totalorder %v226_v15, %v2541_v20  ;;  %v621_v61 = vpop.f32.mrf.mxu0 }
 0x19b   :  { %v409_v1 = vsel %vm261_vm0, %v407_v0, %v2337_v51  ;;  %v410_v2 = vsel %vm261_vm0, %v408_v63, %v2338_v62  ;;  %v232_v47 = vsel %vm230_vm5, 1.0, %v2420_v21 }
 0x19c   :  { %v411_v3 = vsel %vm264_vm2, %v409_v1, %v2342_v10  ;;  %v412_v4 = vsel %vm264_vm2, %v410_v2, %v2343_v60 }
 0x19d   :  { %v413_v34 = vpack.c.bf16 %v411_v3, %v411_v3  ;;  %v414_v29 = vpack.c.bf16 %v412_v4, %v412_v4 }
 0x19f   :  { %v528_v6 = vunpack.c.l.b16 %v413_v34  ;;  %v529_v7 = vunpack.c.l.b16 %v414_v29 }
 0x1a0   :  { %v229_v9 = vpop.permute.xlu1 %228 }
 0x1a1   :  { %vm231_vm6 = vcmp.eq.s32.totalorder %v229_v9, %v2541_v20  ;;  %v530_v44 = vpack.c.b16 %v529_v7, %v528_v6  ;;  %v437_v20 = vsel %vm258_vm1, %v2667_v46, %v2349_v32  ;;  %v2363_v43 = vpop.permute.xlu0 %2362 }
 0x1a2   :  { %v233_v12 = vsel %vm231_vm6, 1.0, %v2420_v21  ;;  %v2365_v39 = vunpack.i.h.bf16 %v2363_v43  ;;  %v2364_v46 = vunpack.i.l.bf16 %v2363_v43 }
 0x1a3   :  { %v2386_v13 = vpack.i.bf16 %v233_v12, %v232_v47 }
 0x1a4   :  { %1878 = vmatmul.msk.bf16.gmra.mxu0 %vm582_vm7, %v530_v44  ;;  %v466_v50 = vsel %vm258_vm1, %v2664_v45, %v2365_v39  ;;  %v465_v52 = vsel %vm258_vm1, %v2656_v35, %v2364_v46 }
 0x1a5   :  { %2387 = vrot.lane.b32.xlu2 %v2386_v13, %s2421_s0  ;;  %v624_v13 = vpop.f32.mrf.mxu0 }
 0x1a8   :  { %v2353_v33 = vpop.permute.xlu1 %2352 }
 0x1a9   :  { %v2355_v17 = vunpack.i.h.bf16 %v2353_v33  ;;  %v2354_v18 = vunpack.i.l.bf16 %v2353_v33  ;;  %v2378_v45 = vpop.permute.xlu0 %2377 }
 0x1aa   :  { %v2380_v62 = vunpack.i.h.bf16 %v2378_v45  ;;  %v2379_v51 = vunpack.i.l.bf16 %v2378_v45 }
 0x1ab   :  { %v440_v26 = vsel %vm261_vm0, %v438_v23, %v2355_v17  ;;  %v439_v27 = vsel %vm261_vm0, %v437_v20, %v2354_v18  ;;  %v2812_v23 = vld [vmem:[%s3339_s2] ss:$0 sm:$0xff] }
 0x1ac   :  { %v494_v3 = vsel %vm258_vm1, %v2696_v11, %v2380_v62  ;;  %v493_v4 = vsel %vm258_vm1, %v2692_v5, %v2379_v51 }
 0x1ad   :  { %v626_v11 = vpop.f32.mrf.mxu0 }
 0x1b5   :  { %v629_v33 = vpop.f32.mrf.mxu0 }
 0x1bd   :  { %v631_v16 = vpop.f32.mrf.mxu0 }
 0x1df   :  { %v2358_v19 = vpop.permute.xlu2 %2357 }
 0x1e0   :  { %v2360_v25 = vunpack.i.h.bf16 %v2358_v19  ;;  %v2359_v21 = vunpack.i.l.bf16 %v2358_v19 }
 0x1e2   :  { %v441_v28 = vsel %vm264_vm2, %v439_v27, %v2359_v21  ;;  %v442_v30 = vsel %vm264_vm2, %v440_v26, %v2360_v25  ;;  %v620_v25 = vadd.f32 %v2812_v23, %v619_v57  ;;  %v622_v21 = vadd.f32 %v2812_v23, %v621_v61 }
 0x1e3   :  { %v443_v48 = vpack.c.bf16 %v441_v28, %v441_v28  ;;  %v444_v31 = vpack.c.bf16 %v442_v30, %v442_v30  ;;  %v625_v28 = vadd.f32 %v2812_v23, %v624_v13  ;;  %v2394_v30 = vpop.permute.xlu0 %2393 }
 0x1e4   :  { %v664_v26 = vmul.f32 0.05, %v620_v25  ;;  %v665_v27 = vmul.f32 0.05, %v622_v21  ;;  %v2824_v43 = vunpack.i.l.bf16 %v2394_v30 }
 0x1e5   :  { %v533_v36 = vunpack.c.l.b16 %v443_v48  ;;  %v534_v37 = vunpack.c.l.b16 %v444_v31  ;;  %v666_v39 = vmul.f32 0.05, %v625_v28 }
 0x1e6   :  { %v2817_v31 = vmax.f32 %v620_v25, %v664_v26 }
 0x1e7   :  { %v535_v38 = vpack.c.b16 %v534_v37, %v533_v36  ;;  %v2819_v36 = vmax.f32 %v622_v21, %v665_v27  ;;  %v627_v37 = vadd.f32 %v2812_v23, %v626_v11 }
 0x1e8   :  { %v753_v46 = vmul.f32 %v2817_v31, %v2817_v31 }
 0x1e9   :  { %1879 = vmatmul.msk.bf16.gmra.mxu0 %vm582_vm7, %v535_v38  ;;  %v2822_v38 = vunpack.i.h.bf16 %v2394_v30 }
 0x1ef   :  { %v2373_v40 = vpop.permute.xlu2 %2372 }
 0x1f0   :  { %v2375_v53 = vunpack.i.h.bf16 %v2373_v40  ;;  %v2374_v24 = vunpack.i.l.bf16 %v2373_v40  ;;  %v754_v40 = vmul.f32 %v2819_v36, %v2819_v36 }
 0x1f7   :  { %v2368_v41 = vpop.permute.xlu1 %2367 }
 0x1f8   :  { %v2370_v42 = vunpack.i.h.bf16 %v2368_v41  ;;  %v2369_v49 = vunpack.i.l.bf16 %v2368_v41  ;;  %v667_v41 = vmul.f32 0.05, %v627_v37 }
 0x1fa   :  { %v467_v55 = vsel %vm261_vm0, %v465_v52, %v2369_v49  ;;  %v468_v22 = vsel %vm261_vm0, %v466_v50, %v2370_v42  ;;  %v712_v42 = vmul.f32 %v2824_v43, %v2817_v31  ;;  %v713_v49 = vmul.f32 %v2822_v38, %v2819_v36 }
 0x1fb   :  { %v469_v56 = vsel %vm264_vm2, %v467_v55, %v2374_v24  ;;  %v470_v58 = vsel %vm264_vm2, %v468_v22, %v2375_v53  ;;  %v2834_v50 = vmax.f32 %v625_v28, %v666_v39  ;;  %v630_v52 = vadd.f32 %v2812_v23, %v629_v33 }
 0x1fc   :  { %v471_v59 = vpack.c.bf16 %v469_v56, %v469_v56  ;;  %v472_v8 = vpack.c.bf16 %v470_v58, %v470_v58  ;;  %v771_v53 = vmul.f32 %v2824_v43, %v753_v46  ;;  %v772_v24 = vmul.f32 %v2822_v38, %v754_v40 }
 0x1fd   :  { %v632_v55 = vadd.f32 %v2812_v23, %v631_v16  ;;  %v2841_v57 = vmax.f32 %v627_v37, %v667_v41  ;;  %v730_v56 = vadd.f32 %v713_v49, %v712_v42 }
 0x1fe   :  { %v538_v54 = vunpack.c.l.b16 %v471_v59  ;;  %v539_v60 = vunpack.c.l.b16 %v472_v8  ;;  %v755_v59 = vmul.f32 %v2834_v50, %v2834_v50  ;;  %v668_v8 = vmul.f32 0.05, %v630_v52 }
 0x1ff   :  { %v2388_v35 = vpop.permute.xlu2 %2387  ;;  %v634_v5 = vpop.f32.mrf.mxu0  ;;  %v669_v45 = vmul.f32 0.05, %v632_v55  ;;  %v756_v51 = vmul.f32 %v2841_v57, %v2841_v57 }
 0x200   :  { %v540_v10 = vpack.c.b16 %v539_v60, %v538_v54  ;;  %v2390_v0 = vunpack.i.h.bf16 %v2388_v35  ;;  %v2389_v1 = vunpack.i.l.bf16 %v2388_v35  ;;  %v635_v22 = vadd.f32 %v2812_v23, %v634_v5 }
 0x201   :  { %v789_v54 = vadd.f32 %v772_v24, %v771_v53  ;;  %v773_v61 = vmul.f32 %v2824_v43, %v755_v59 }
 0x202   :  { %1880 = vmatmul.msk.bf16.gmra.mxu0 %vm582_vm7, %v540_v10  ;;  %v714_v10 = vmul.f32 %v2824_v43, %v2834_v50  ;;  %v670_v35 = vmul.f32 0.05, %v635_v22 }
 0x207   :  { %v2383_v63 = vpop.permute.xlu1 %2382  ;;  %v636_v32 = vpop.f32.mrf.mxu0 }
 0x208   :  { %v2385_v2 = vunpack.i.h.bf16 %v2383_v63  ;;  %v2384_v15 = vunpack.i.l.bf16 %v2383_v63  ;;  %v637_v60 = vadd.f32 %v2812_v23, %v636_v32  ;;  %v731_v63 = vadd.f32 %v730_v56, %v714_v10 }
 0x20a   :  { %v495_v34 = vsel %vm261_vm0, %v493_v4, %v2384_v15  ;;  %v496_v29 = vsel %vm261_vm0, %v494_v3, %v2385_v2  ;;  %v671_v2 = vmul.f32 0.05, %v637_v60  ;;  %v715_v3 = vmul.f32 %v2822_v38, %v2841_v57 }
 0x20b   :  { %v497_v6 = vsel %vm264_vm2, %v495_v34, %v2389_v1  ;;  %v498_v7 = vsel %vm264_vm2, %v496_v29, %v2390_v0  ;;  %v2852_v0 = vmax.f32 %v630_v52, %v668_v8  ;;  %v790_v1 = vadd.f32 %v789_v54, %v773_v61 }
 0x20c   :  { %v499_v47 = vpack.c.bf16 %v497_v6, %v497_v6  ;;  %v500_v9 = vpack.c.bf16 %v498_v7, %v498_v7  ;;  %v2857_v4 = vmax.f32 %v632_v55, %v669_v45  ;;  %v2859_v34 = vmax.f32 %v635_v22, %v670_v35 }
 0x20d   :  { %v774_v29 = vmul.f32 %v2822_v38, %v756_v51  ;;  %v732_v7 = vadd.f32 %v731_v63, %v715_v3  ;;  %v2865_v13 = vmax.f32 %v637_v60, %v671_v2  ;;  %v716_v11 = vmul.f32 %v2824_v43, %v2852_v0 }
 0x20e   :  { %v543_v44 = vunpack.c.l.b16 %v499_v47  ;;  %v544_v12 = vunpack.c.l.b16 %v500_v9  ;;  %v758_v16 = vmul.f32 %v2857_v4, %v2857_v4  ;;  %v759_v5 = vmul.f32 %v2859_v34, %v2859_v34 }
 0x20f   :  { %v760_v26 = vmul.f32 %v2865_v13, %v2865_v13  ;;  %v718_v28 = vmul.f32 %v2824_v43, %v2859_v34  ;;  %v719_v41 = vmul.f32 %v2822_v38, %v2865_v13 }
 0x210   :  { %v545_v14 = vpack.c.b16 %v544_v12, %v543_v44  ;;  %v757_v44 = vmul.f32 %v2852_v0, %v2852_v0  ;;  %v791_v12 = vadd.f32 %v790_v1, %v774_v29  ;;  %v776_v39 = vmul.f32 %v2822_v38, %v758_v16 }
 0x211   :  { %v639_v17 = vpop.f32.mrf.mxu0  ;;  %v777_v46 = vmul.f32 %v2824_v43, %v759_v5  ;;  %v778_v24 = vmul.f32 %v2822_v38, %v760_v26 }
 0x212   :  { %1881 = vmatmul.msk.bf16.gmra.mxu0 %vm582_vm7, %v545_v14  ;;  %v640_v62 = vadd.f32 %v2812_v23, %v639_v17  ;;  %v775_v32 = vmul.f32 %v2824_v43, %v757_v44 }
 0x214   :  { %v672_v6 = vmul.f32 0.05, %v640_v62  ;;  %v792_v21 = vadd.f32 %v791_v12, %v775_v32 }
 0x216   :  { %v2875_v17 = vmax.f32 %v640_v62, %v672_v6  ;;  %v793_v53 = vadd.f32 %v792_v21, %v776_v39 }
 0x218   :  { %v794_v54 = vadd.f32 %v793_v53, %v777_v46 }
 0x219   :  { %v641_v18 = vpop.f32.mrf.mxu0 }
 0x21a   :  { %v642_v15 = vadd.f32 %v2812_v23, %v641_v18  ;;  %v733_v18 = vadd.f32 %v732_v7, %v716_v11  ;;  %v795_v51 = vadd.f32 %v794_v54, %v778_v24 }
 0x21c   :  { %v673_v14 = vmul.f32 0.05, %v642_v15 }
 0x21e   :  { %v2880_v27 = vmax.f32 %v642_v15, %v673_v14 }
 0x220   :  { %v762_v55 = vmul.f32 %v2880_v27, %v2880_v27  ;;  %v721_v35 = vmul.f32 %v2822_v38, %v2880_v27 }
 0x221   :  { %v644_v19 = vpop.f32.mrf.mxu0 }
 0x222   :  { %v645_v47 = vadd.f32 %v2812_v23, %v644_v19  ;;  %v780_v63 = vmul.f32 %v2822_v38, %v762_v55 }
 0x224   :  { %v674_v19 = vmul.f32 0.05, %v645_v47 }
 0x226   :  { %v2893_v42 = vmax.f32 %v645_v47, %v674_v19 }
 0x228   :  { %v763_v61 = vmul.f32 %v2893_v42, %v2893_v42  ;;  %v722_v15 = vmul.f32 %v2824_v43, %v2893_v42 }
 0x229   :  { %v646_v20 = vpop.f32.mrf.mxu0 }
 0x22a   :  { %v647_v33 = vadd.f32 %v2812_v23, %v646_v20  ;;  %v717_v20 = vmul.f32 %v2822_v38, %v2857_v4 }
 0x22c   :  { %v675_v30 = vmul.f32 0.05, %v647_v33  ;;  %v734_v40 = vadd.f32 %v733_v18, %v717_v20 }
 0x22e   :  { %v735_v56 = vadd.f32 %v734_v40, %v718_v28  ;;  %v2901_v59 = vmax.f32 %v647_v33, %v675_v30 }
 0x230   :  { %v736_v45 = vadd.f32 %v735_v56, %v719_v41  ;;  %v764_v3 = vmul.f32 %v2901_v59, %v2901_v59  ;;  %v723_v44 = vmul.f32 %v2822_v38, %v2901_v59 }
 0x232   :  { %v782_v32 = vmul.f32 %v2822_v38, %v764_v3 }
 0x266   :  { %v649_v48 = vpop.f32.mrf.mxu0 }
 0x267   :  { %v650_v25 = vadd.f32 %v2812_v23, %v649_v48  ;;  %v761_v48 = vmul.f32 %v2875_v17, %v2875_v17 }
 0x269   :  { %v676_v49 = vmul.f32 0.05, %v650_v25  ;;  %v779_v60 = vmul.f32 %v2824_v43, %v761_v48 }
 0x26b   :  { %v2909_v62 = vmax.f32 %v650_v25, %v676_v49  ;;  %v796_v6 = vadd.f32 %v795_v51, %v779_v60 }
 0x26d   :  { %v765_v12 = vmul.f32 %v2909_v62, %v2909_v62  ;;  %v797_v11 = vadd.f32 %v796_v6, %v780_v63  ;;  %v724_v18 = vmul.f32 %v2824_v43, %v2909_v62 }
 0x26e   :  { %v651_v58 = vpop.f32.mrf.mxu0 }
 0x26f   :  { %v652_v37 = vadd.f32 %v2812_v23, %v651_v58  ;;  %v720_v58 = vmul.f32 %v2824_v43, %v2875_v17  ;;  %v783_v28 = vmul.f32 %v2824_v43, %v765_v12  ;;  %v2148_v12 = vld [vmem:[%s3340_s5 + $0x30] sm:$0xff] }
 0x271   :  { %v677_v8 = vmul.f32 0.05, %v652_v37  ;;  %v737_v2 = vadd.f32 %v736_v45, %v720_v58 }
 0x273   :  { %v2916_v29 = vmax.f32 %v652_v37, %v677_v8  ;;  %v738_v47 = vadd.f32 %v737_v2, %v721_v35  ;;  %v2165_v2 = vld [vmem:[%s3340_s5 + $0xb8] sm:$0xff] }
 0x274   :  { %1261 = vmatpush.bf16.msra.mxu3 %v2165_v2 }
 0x275   :  { %v739_v5 = vadd.f32 %v738_v47, %v722_v15  ;;  %v766_v19 = vmul.f32 %v2916_v29, %v2916_v29  ;;  %v725_v30 = vmul.f32 %v2822_v38, %v2916_v29 }
 0x277   :  { %v740_v20 = vadd.f32 %v739_v5, %v723_v44  ;;  %v784_v40 = vmul.f32 %v2822_v38, %v766_v19  ;;  %v2147_v19 = vld [vmem:[%s3340_s5 + $0x28] sm:$0xff] }
 0x279   :  { %v741_v48 = vadd.f32 %v740_v20, %v724_v18 }
 0x27b   :  { %v742_v53 = vadd.f32 %v741_v48, %v725_v30  ;;  %v2154_v48 = vld [vmem:[%s3340_s5 + $0x60] sm:$0xff] }
 0x27f   :  { %v654_v9 = vpop.f32.mrf.mxu0 }
 0x280   :  { %v655_v22 = vadd.f32 %v2812_v23, %v654_v9  ;;  %v781_v9 = vmul.f32 %v2824_v43, %v763_v61 }
 0x282   :  { %v678_v1 = vmul.f32 0.05, %v655_v22  ;;  %v798_v26 = vadd.f32 %v797_v11, %v781_v9  ;;  %v2164_v11 = vld [vmem:[%s3340_s5 + $0xb0] sm:$0xff] }
 0x283   :  { %1262 = vmatpush.bf16.msra.mxu3 %v2164_v11 }
 0x284   :  { %v2923_v33 = vmax.f32 %v655_v22, %v678_v1  ;;  %v799_v46 = vadd.f32 %v798_v26, %v782_v32  ;;  %v2149_v1 = vld [vmem:[%s3340_s5 + $0x38] sm:$0xff]  ;;  %v2163_v26 = vld [vmem:[%s3340_s5 + $0xa8] sm:$0xff] }
 0x285   :  { %1203 = vmatpush.bf16.msra.mxu1 %v2149_v1 }
 0x286   :  { %v767_v37 = vmul.f32 %v2923_v33, %v2923_v33  ;;  %v726_v41 = vmul.f32 %v2824_v43, %v2923_v33 }
 0x287   :  { %v656_v52 = vpop.f32.mrf.mxu0  ;;  %1263 = vmatpush.bf16.msra.mxu3 %v2163_v26 }
 0x288   :  { %v657_v10 = vadd.f32 %v2812_v23, %v656_v52  ;;  %v800_v52 = vadd.f32 %v799_v46, %v783_v28  ;;  %v785_v55 = vmul.f32 %v2824_v43, %v767_v37  ;;  %v743_v54 = vadd.f32 %v742_v53, %v726_v41  ;;  %v2146_v46 = vld [vmem:[%s3340_s5 + $0x20] sm:$0xff] }
 0x289   :  { %1204 = vmatpush.bf16.msra.mxu1 %v2148_v12 }
 0x28a   :  { %v679_v7 = vmul.f32 0.05, %v657_v10  ;;  %v801_v8 = vadd.f32 %v800_v52, %v784_v40  ;;  %v2162_v40 = vld [vmem:[%s3340_s5 + $0xa0] sm:$0xff] }
 0x28b   :  { %1264 = vmatpush.bf16.msra.mxu3 %v2162_v40 }
 0x28c   :  { %v2931_v25 = vmax.f32 %v657_v10, %v679_v7  ;;  %v802_v35 = vadd.f32 %v801_v8, %v785_v55  ;;  %v2153_v55 = vld [vmem:[%s3340_s5 + $0x58] sm:$0xff] }
 0x28d   :  { %1205 = vmatpush.bf16.msra.mxu1 %v2147_v19  ;;  %v701_v19 = vld [vmem:[%s3342_s4] sm:$0x1] }
 0x28e   :  { %v768_v49 = vmul.f32 %v2931_v25, %v2931_v25  ;;  %v727_v22 = vmul.f32 %v2822_v38, %v2931_v25 }
 0x28f   :  { %v659_v14 = vpop.f32.mrf.mxu0 }
 0x290   :  { %v660_v16 = vadd.f32 %v2812_v23, %v659_v14  ;;  %v786_v60 = vmul.f32 %v2822_v38, %v768_v49  ;;  %v744_v61 = vadd.f32 %v743_v54, %v727_v22  ;;  %v2156_v14 = vld [vmem:[%s3340_s5 + $0x70] sm:$0xff]  ;;  %v2161_v22 = vld [vmem:[%s3340_s5 + $0x98] sm:$0xff] }
 0x291   :  { %1206 = vmatpush.bf16.msra.mxu1 %v2146_v46  ;;  %1265 = vmatpush.bf16.msra.mxu3 %v2161_v22 }
 0x292   :  { %v680_v21 = vmul.f32 0.05, %v660_v16  ;;  %v803_v15 = vadd.f32 %v802_v35, %v786_v60  ;;  %v2144_v60 = vld [vmem:[%s3340_s5 + $0x10] sm:$0xff] }
 0x294   :  { %v2938_v39 = vmax.f32 %v660_v16, %v680_v21  ;;  %v2155_v21 = vld [vmem:[%s3340_s5 + $0x68] sm:$0xff] }
 0x296   :  { %v769_v56 = vmul.f32 %v2938_v39, %v2938_v39  ;;  %v728_v10 = vmul.f32 %v2824_v43, %v2938_v39 }
 0x297   :  { %v661_v24 = vpop.f32.mrf.mxu0 }
 0x298   :  { %v662_v58 = vadd.f32 %v2812_v23, %v661_v24  ;;  %v787_v51 = vmul.f32 %v2824_v43, %v769_v56  ;;  %v2157_v23 = vld [vmem:[%s3340_s5 + $0x78] sm:$0xff]  ;;  %v745_v3 = vadd.f32 %v744_v61, %v728_v10  ;;  %v2152_v10 = vld [vmem:[%s3340_s5 + $0x50] sm:$0xff]  ;;  %v2143_v61 = vld [vmem:[%s3340_s5 + $0x8] sm:$0xff] }
 0x299   :  { %1232 = vmatpush.bf16.msra.mxu2 %v2157_v23  ;;  %v2145_v24 = vld [vmem:[%s3340_s5 + $0x18] sm:$0xff]  ;;  %v2159_v23 = vld [vmem:[%s3340_s5 + $0x88] sm:$0xff] }
 0x29a   :  { %v681_v45 = vmul.f32 0.05, %v662_v58  ;;  %v804_v47 = vadd.f32 %v803_v15, %v787_v51  ;;  %1207 = vmatpush.bf16.msra.mxu1 %v2145_v24  ;;  %v2151_v51 = vld [vmem:[%s3340_s5 + $0x48] sm:$0xff]  ;;  %v2142_v15 = vld [vmem:[%s3340_s5] sm:$0xff] }
 0x29c   :  { %v2955_v63 = vmax.f32 %v662_v58, %v681_v45  ;;  %v2160_v45 = vld [vmem:[%s3340_s5 + $0x90] sm:$0xff] }
 0x29d   :  { %1233 = vmatpush.bf16.msra.mxu2 %v2156_v14  ;;  %1266 = vmatpush.bf16.msra.mxu3 %v2160_v45 }
 0x29e   :  { %v729_v6 = vmul.f32 %v2822_v38, %v2955_v63  ;;  %v770_v7 = vmul.f32 %v2955_v63, %v2955_v63  ;;  %1208 = vmatpush.bf16.msra.mxu1 %v2144_v60 }
 0x2a0   :  { %v746_v9 = vadd.f32 %v745_v3, %v729_v6  ;;  %v788_v44 = vmul.f32 %v2822_v38, %v770_v7  ;;  %v2150_v3 = vld [vmem:[%s3340_s5 + $0x40] sm:$0xff]  ;;  %v2173_v7 = vld [vmem:[%s3340_s5 + $0xf8] sm:$0xff] }
 0x2a1   :  { %1234 = vmatpush.bf16.msra.mxu2 %v2155_v21  ;;  %1267 = vmatpush.bf16.msra.mxu3 %v2159_v23  ;;  %v2158_v6 = vld [vmem:[%s3340_s5 + $0x80] sm:$0xff]  ;;  %v2171_v21 = vld [vmem:[%s3340_s5 + $0xe8] sm:$0xff] }
 0x2a2   :  { %v747_v16 = vrot.slane %v746_v9, 4  ;;  %v805_v5 = vadd.f32 %v804_v47, %v788_v44  ;;  %1209 = vmatpush.bf16.msra.mxu1 %v2143_v61  ;;  %v2172_v47 = vld [vmem:[%s3340_s5 + $0xf0] sm:$0xff] }
 0x2a4   :  { %v748_v32 = vadd.f32 %v747_v16, %v746_v9  ;;  %v806_v18 = vrot.slane %v805_v5, 4  ;;  %v700_v16 = vld [vmem:[%s3341_s3] sm:$0x1] }
 0x2a5   :  { %1235 = vmatpush.bf16.msra.mxu2 %v2154_v48  ;;  %1268 = vmatpush.bf16.msra.mxu3 %v2158_v6  ;;  %v2169_v6 = vld [vmem:[%s3340_s5 + $0xd8] sm:$0xff] }
 0x2a6   :  { %v749_v20 = vrot.slane %v748_v32, 2  ;;  %v807_v28 = vadd.f32 %v806_v18, %v805_v5  ;;  %1210 = vmatpush.bf16.msra.mxu1 %v2142_v15 }
 0x2a8   :  { %v750_v30 = vadd.f32 %v749_v20, %v748_v32  ;;  %v808_v37 = vrot.slane %v807_v28, 2 }
 0x2a9   :  { %1236 = vmatpush.bf16.msra.mxu2 %v2153_v55 }
 0x2aa   :  { %v751_v41 = vrot.slane %v750_v30, 1  ;;  %v809_v49 = vadd.f32 %v808_v37, %v807_v28  ;;  %1290 = vmatpush.bf16.msrb.mxu1 %v2173_v7  ;;  %v2170_v28 = vld [vmem:[%s3340_s5 + $0xe0] sm:$0xff] }
 0x2ac   :  { %v752_v52 = vadd.f32 %v751_v41, %v750_v30  ;;  %v810_v53 = vrot.slane %v809_v49, 1 }
 0x2ad   :  { %1237 = vmatpush.bf16.msra.mxu2 %v2152_v10 }
 0x2ae   :  { %v811_v56 = vadd.f32 %v810_v53, %v809_v49  ;;  %v812_v58 = vmul.f32 0.013888889, %v752_v52  ;;  %1291 = vmatpush.bf16.msrb.mxu1 %v2172_v47 }
 0x2b0   :  { %v813_v8 = vmul.f32 0.013888889, %v811_v56  ;;  %v814_v54 = vmul.f32 %v812_v58, %v812_v58 }
 0x2b1   :  { %1238 = vmatpush.bf16.msra.mxu2 %v2151_v51 }
 0x2b2   :  { %v815_v35 = vsub.f32 %v813_v8, %v814_v54  ;;  %1292 = vmatpush.bf16.msrb.mxu1 %v2171_v21 }
 0x2b4   :  { %v816_v1 = vmax.f32 %v815_v35, 0.0 }
 0x2b5   :  { %1239 = vmatpush.bf16.msra.mxu2 %v2150_v3 }
 0x2b6   :  { %v817_v2 = vadd.f32 1e-05, %v816_v1  ;;  %1293 = vmatpush.bf16.msrb.mxu1 %v2170_v28 }
 0x2b8   :  { %2400 = vrsqrt.f32 %v817_v2  ;;  %vm824_vm1 = vweird.f32 %v817_v2 }
 0x2ba   :  { %1294 = vmatpush.bf16.msrb.mxu1 %v2169_v6 }
 0x2be   :  { %v2401_v9 = vpop.eup %2400 }
 0x2bf   :  { %v819_v44 = vmul.f32 %v2401_v9, %v817_v2  ;;  %vm825_vm0 = vweird.f32 %v2401_v9 }
 0x2c0   :  { %vm826_vm2 = vmor %vm824_vm1, %vm825_vm0 }
 0x2c1   :  { %v820_v12 = vmul.f32 %v2401_v9, %v819_v44 }
 0x2c3   :  { %v821_v14 = vmul.f32 0.5, %v820_v12 }
 0x2c5   :  { %v822_v11 = vsub.f32 1.5, %v821_v14 }
 0x2c7   :  { %v823_v5 = vmul.f32 %v2401_v9, %v822_v11 }
 0x2c9   :  { %v827_v32 = vsel %vm826_vm2, %v2401_v9, %v823_v5 }
 0x2ca   :  { %v828_v18 = vmul.f32 %v827_v32, %v700_v16 }
 0x2cc   :  { %v829_v26 = vmul.f32 %v828_v18, %v812_v58  ;;  %v3049_v20 = vperm.slane %v828_v18, 0 }
 0x2ce   :  { %v830_v30 = vsub.f32 %v701_v19, %v829_v26  ;;  %v832_v37 = vmul.f32 %v3049_v20, %v2817_v31  ;;  %v833_v48 = vmul.f32 %v3049_v20, %v2819_v36  ;;  %v834_v40 = vmul.f32 %v3049_v20, %v2834_v50 }
 0x2cf   :  { %v835_v41 = vmul.f32 %v3049_v20, %v2841_v57  ;;  %v838_v49 = vmul.f32 %v3049_v20, %v2859_v34  ;;  %v839_v52 = vmul.f32 %v3049_v20, %v2865_v13  ;;  %v836_v23 = vmul.f32 %v3049_v20, %v2852_v0 }
 0x2d0   :  { %v3056_v46 = vperm.slane %v830_v30, 0  ;;  %v837_v2 = vmul.f32 %v3049_v20, %v2857_v4  ;;  %v840_v15 = vmul.f32 %v3049_v20, %v2875_v17  ;;  %v841_v3 = vmul.f32 %v3049_v20, %v2880_v27  ;;  %v2168_v4 = vld [vmem:[%s3340_s5 + $0xd0] sm:$0xff] }
 0x2d1   :  { %v848_v17 = vmul.f32 %v3049_v20, %v2938_v39  ;;  %v849_v27 = vmul.f32 %v3049_v20, %v2955_v63  ;;  %1295 = vmatpush.bf16.msrb.mxu1 %v2168_v4 }
 0x2d2   :  { %v853_v31 = vadd.f32 %v3056_v46, %v832_v37  ;;  %v854_v53 = vadd.f32 %v3056_v46, %v833_v48  ;;  %v855_v24 = vadd.f32 %v3056_v46, %v834_v40  ;;  %v856_v36 = vadd.f32 %v3056_v46, %v835_v41 }
 0x2d3   :  { %v859_v50 = vadd.f32 %v3056_v46, %v838_v49  ;;  %v860_v55 = vadd.f32 %v3056_v46, %v839_v52  ;;  %v857_v7 = vadd.f32 %v3056_v46, %v836_v23  ;;  %v858_v47 = vadd.f32 %v3056_v46, %v837_v2  ;;  %v2167_v49 = vld [vmem:[%s3340_s5 + $0xc8] sm:$0xff] }
 0x2d4   :  { %v871_v57 = vpack.c.bf16 %v853_v31, %v853_v31  ;;  %v872_v22 = vpack.c.bf16 %v854_v53, %v854_v53  ;;  %v873_v56 = vpack.c.bf16 %v855_v24, %v855_v24  ;;  %v874_v34 = vpack.c.bf16 %v856_v36, %v856_v36  ;;  %v2166_v53 = vld [vmem:[%s3340_s5 + $0xc0] sm:$0xff] }
 0x2d5   :  { %v877_v58 = vpack.c.bf16 %v859_v50, %v859_v50  ;;  %v878_v8 = vpack.c.bf16 %v860_v55, %v860_v55  ;;  %v861_v0 = vadd.f32 %v3056_v46, %v840_v15  ;;  %v862_v9 = vadd.f32 %v3056_v46, %v841_v3  ;;  %1296 = vmatpush.bf16.msrb.mxu1 %v2167_v49 }
 0x2d6   :  { %v891_v13 = vunpack.c.l.b16 %v871_v57  ;;  %v892_v54 = vunpack.c.l.b16 %v872_v22  ;;  %v897_v60 = vunpack.c.l.b16 %v873_v56  ;;  %v898_v10 = vunpack.c.l.b16 %v874_v34 }
 0x2d7   :  { %v903_v45 = vunpack.c.l.b16 %v877_v58  ;;  %v904_v35 = vunpack.c.l.b16 %v878_v8  ;;  %v875_v44 = vpack.c.bf16 %v857_v7, %v857_v7  ;;  %v876_v12 = vpack.c.bf16 %v858_v47, %v858_v47  ;;  %v3129_v47 = vld [vmem:[%s3343_s6] ss:$0 sm:$0xff] }
 0x2d8   :  { %v893_v61 = vpack.c.b16 %v892_v54, %v891_v13  ;;  %v899_v51 = vpack.c.b16 %v898_v10, %v897_v60  ;;  %v869_v14 = vadd.f32 %v3056_v46, %v848_v17  ;;  %v879_v11 = vpack.c.bf16 %v861_v0, %v861_v0 }
 0x2d9   :  { %v905_v1 = vpack.c.b16 %v904_v35, %v903_v45  ;;  %v880_v16 = vpack.c.bf16 %v862_v9, %v862_v9  ;;  %v870_v5 = vadd.f32 %v3056_v46, %v849_v27  ;;  %v915_v19 = vunpack.c.l.b16 %v875_v44  ;;  %1297 = vmatpush.bf16.msrb.mxu1 %v2166_v53 }
 0x2da   :  { %1211 = vmatmul.bf16.vlgmr.msra.gmra.mxu1 %v893_v61  ;;  %1240 = vmatmul.bf16.vlgmr.msra.gmra.mxu2 %v899_v51  ;;  %v887_v32 = vpack.c.bf16 %v869_v14, %v869_v14  ;;  %v916_v21 = vunpack.c.l.b16 %v876_v12  ;;  %v909_v28 = vunpack.c.l.b16 %v879_v11  ;;  %v844_v40 = vmul.f32 %v3049_v20, %v2909_v62 }
 0x2db   :  { %1269 = vmatmul.bf16.vlgmr.msra.gmra.mxu3 %v905_v1  ;;  %v888_v18 = vpack.c.bf16 %v870_v5, %v870_v5  ;;  %v910_v30 = vunpack.c.l.b16 %v880_v16  ;;  %v845_v41 = vmul.f32 %v3049_v20, %v2916_v29  ;;  %v842_v29 = vmul.f32 %v3049_v20, %v2893_v42 }
 0x2dc   :  { %v939_v26 = vunpack.c.l.b16 %v887_v32  ;;  %v917_v48 = vpack.c.b16 %v916_v21, %v915_v19  ;;  %v865_v52 = vadd.f32 %v3056_v46, %v844_v40  ;;  %v843_v57 = vmul.f32 %v3049_v20, %v2901_v59 }
 0x2dd   :  { %v940_v39 = vunpack.c.l.b16 %v888_v18  ;;  %v911_v63 = vpack.c.b16 %v910_v30, %v909_v28  ;;  %v866_v31 = vadd.f32 %v3056_v46, %v845_v41  ;;  %v846_v22 = vmul.f32 %v3049_v20, %v2923_v33 }
 0x2de   :  { %v883_v24 = vpack.c.bf16 %v865_v52, %v865_v52  ;;  %v847_v56 = vmul.f32 %v3049_v20, %v2931_v25  ;;  %v863_v34 = vadd.f32 %v3056_v46, %v842_v29  ;;  %v864_v58 = vadd.f32 %v3056_v46, %v843_v57 }
 0x2df   :  { %v941_v37 = vpack.c.b16 %v940_v39, %v939_v26  ;;  %v884_v36 = vpack.c.bf16 %v866_v31, %v866_v31  ;;  %v867_v8 = vadd.f32 %v3056_v46, %v846_v22 }
 0x2e0   :  { %v927_v62 = vunpack.c.l.b16 %v883_v24  ;;  %v868_v13 = vadd.f32 %v3056_v46, %v847_v56  ;;  %v881_v54 = vpack.c.bf16 %v863_v34, %v863_v34  ;;  %v882_v42 = vpack.c.bf16 %v864_v58, %v864_v58 }
 0x2e1   :  { %v928_v50 = vunpack.c.l.b16 %v884_v36  ;;  %v885_v60 = vpack.c.bf16 %v867_v8, %v867_v8 }
 0x2e2   :  { %v886_v10 = vpack.c.bf16 %v868_v13, %v868_v13  ;;  %v921_v59 = vunpack.c.l.b16 %v881_v54  ;;  %v922_v45 = vunpack.c.l.b16 %v882_v42 }
 0x2e3   :  { %v929_v55 = vpack.c.b16 %v928_v50, %v927_v62  ;;  %v933_v35 = vunpack.c.l.b16 %v885_v60 }
 0x2e4   :  { %v934_v61 = vunpack.c.l.b16 %v886_v10  ;;  %v923_v33 = vpack.c.b16 %v922_v45, %v921_v59 }
 0x2ea   :  { %1216 = vmatmul.bf16.gmra.mxu1 %v899_v51  ;;  %1245 = vmatmul.bf16.gmra.mxu2 %v917_v48  ;;  %v935_v51 = vpack.c.b16 %v934_v61, %v933_v35 }
 0x2eb   :  { %1274 = vmatmul.bf16.gmra.mxu3 %v911_v63 }
 0x2fa   :  { %1221 = vmatmul.bf16.gmra.mxu1 %v905_v1  ;;  %1250 = vmatmul.bf16.gmra.mxu2 %v911_v63 }
 0x2fb   :  { %1279 = vmatmul.bf16.gmra.mxu3 %v929_v55 }
 0x30a   :  { %1226 = vmatmul.bf16.gmra.mxu1 %v911_v63  ;;  %1255 = vmatmul.bf16.gmra.mxu2 %v923_v33 }
 0x30b   :  { %1284 = vmatmul.bf16.gmra.mxu3 %v935_v51 }
 0x31a   :  { %1298 = vmatmul.bf16.vlgmr.msrb.gmra.mxu1 %v911_v63 }
 0x32a   :  { %1303 = vmatmul.bf16.gmra.mxu1 %v923_v33 }
 0x33a   :  { %1308 = vmatmul.bf16.gmra.mxu1 %v935_v51 }
 0x34a   :  { %1313 = vmatmul.bf16.gmra.mxu1 %v941_v37 }
 0x357   :  { %v1212_v25 = vpop.f32.mrf.mxu1 }
 0x358   :  { %v1213_v9 = vadd.f32 %v3129_v47, %v1212_v25 }
 0x35d   :  { %v1241_v15 = vpop.f32.mrf.mxu2 }
 0x35e   :  { %v1270_v3 = vpop.f32.mrf.mxu3  ;;  %v1242_v17 = vadd.f32 %v1241_v15, %v1213_v9 }
 0x35f   :  { %v1214_v20 = vpop.f32.mrf.mxu1 }
 0x360   :  { %v1271_v44 = vadd.f32 %v1270_v3, %v1242_v17  ;;  %v1215_v14 = vadd.f32 %v3129_v47, %v1214_v20 }
 0x365   :  { %v1243_v7 = vpop.f32.mrf.mxu2 }
 0x366   :  { %v1272_v4 = vpop.f32.mrf.mxu3  ;;  %v1244_v16 = vadd.f32 %v1243_v7, %v1215_v14 }
 0x367   :  { %v1217_v46 = vpop.f32.mrf.mxu1 }
 0x368   :  { %v1273_v18 = vadd.f32 %v1272_v4, %v1244_v16  ;;  %v1218_v26 = vadd.f32 %v3129_v47, %v1217_v46 }
 0x36d   :  { %v1246_v27 = vpop.f32.mrf.mxu2 }
 0x36e   :  { %v1275_v5 = vpop.f32.mrf.mxu3  ;;  %v1247_v39 = vadd.f32 %v1246_v27, %v1218_v26 }
 0x36f   :  { %v1219_v1 = vpop.f32.mrf.mxu1 }
 0x370   :  { %v1276_v41 = vadd.f32 %v1275_v5, %v1247_v39  ;;  %v1220_v53 = vadd.f32 %v3129_v47, %v1219_v1 }
 0x375   :  { %v1248_v19 = vpop.f32.mrf.mxu2 }
 0x376   :  { %v1277_v48 = vpop.f32.mrf.mxu3  ;;  %v1249_v57 = vadd.f32 %v1248_v19, %v1220_v53 }
 0x377   :  { %v1222_v23 = vpop.f32.mrf.mxu1 }
 0x378   :  { %v1278_v58 = vadd.f32 %v1277_v48, %v1249_v57  ;;  %v1223_v45 = vadd.f32 %v3129_v47, %v1222_v23 }
 0x37d   :  { %v1251_v36 = vpop.f32.mrf.mxu2 }
 0x37e   :  { %v1280_v8 = vpop.f32.mrf.mxu3  ;;  %v1252_v51 = vadd.f32 %v1251_v36, %v1223_v45 }
 0x37f   :  { %v3122_v2 = vpop.f32.mrf.mxu1 }
 0x380   :  { %v1281_v15 = vadd.f32 %v1280_v8, %v1252_v51  ;;  %v1225_v3 = vadd.f32 %v3129_v47, %v3122_v2  ;;  %v2188_v51 = vld [vmem:[%s3345_s9 + $0x70] sm:$0xff] }
 0x385   :  { %v1253_v35 = vpop.f32.mrf.mxu2 }
 0x386   :  { %v1282_v7 = vpop.f32.mrf.mxu3  ;;  %v1254_v4 = vadd.f32 %v1253_v35, %v1225_v3  ;;  %v2179_v3 = vld [vmem:[%s3345_s9 + $0x28] sm:$0xff] }
 0x387   :  { %v3124_v6 = vpop.f32.mrf.mxu1 }
 0x388   :  { %v1228_v16 = vadd.f32 %v3129_v47, %v3124_v6 }
 0x38f   :  { %v3131_v0 = vpop.f32.mrf.mxu1 }
 0x397   :  { %v1299_v12 = vpop.f32.mrf.mxu1 }
 0x398   :  { %v1300_v11 = vadd.f32 %v1299_v12, %v1271_v44  ;;  %v1256_v44 = vpop.f32.mrf.mxu2  ;;  %v1283_v12 = vadd.f32 %v1282_v7, %v1254_v4 }
 0x39a   :  { %v1319_v32 = vmul.f32 0.05, %v1300_v11 }
 0x39c   :  { %v3136_v28 = vmax.f32 %v1300_v11, %v1319_v32  ;;  %v1257_v32 = vadd.f32 %v1256_v44, %v1228_v16  ;;  %v2177_v16 = vld [vmem:[%s3345_s9 + $0x18] sm:$0xff] }
 0x39e   :  { %v1358_v63 = vmul.f32 %v3136_v28, %v3136_v28  ;;  %v1337_v49 = vmul.f32 %v2824_v43, %v3136_v28 }
 0x39f   :  { %v1301_v21 = vpop.f32.mrf.mxu1 }
 0x3a0   :  { %v1302_v30 = vadd.f32 %v1301_v21, %v1273_v18  ;;  %v1366_v62 = vmul.f32 %v2824_v43, %v1358_v63  ;;  %v1285_v18 = vpop.f32.mrf.mxu3 }
 0x3a1   :  { %v1286_v26 = vadd.f32 %v1285_v18, %v1257_v32 }
 0x3a2   :  { %v1320_v37 = vmul.f32 0.05, %v1302_v30 }
 0x3a4   :  { %v3140_v40 = vmax.f32 %v1302_v30, %v1320_v37  ;;  %v1258_v30 = vpop.f32.mrf.mxu2  ;;  %v1230_v37 = vadd.f32 %v3129_v47, %v3131_v0 }
 0x3a6   :  { %v1338_v52 = vmul.f32 %v2822_v38, %v3140_v40  ;;  %v1359_v31 = vmul.f32 %v3140_v40, %v3140_v40 }
 0x3a7   :  { %v1304_v24 = vpop.f32.mrf.mxu1 }
 0x3a8   :  { %v1345_v50 = vadd.f32 %v1338_v52, %v1337_v49  ;;  %v1367_v55 = vmul.f32 %v2822_v38, %v1359_v31  ;;  %v1305_v29 = vadd.f32 %v1304_v24, %v1276_v41  ;;  %v1259_v49 = vadd.f32 %v1258_v30, %v1230_v37  ;;  %v1287_v24 = vpop.f32.mrf.mxu3  ;;  %v2176_v30 = vld [vmem:[%s3345_s9 + $0x10] sm:$0xff] }
 0x3aa   :  { %v1374_v22 = vadd.f32 %v1367_v55, %v1366_v62  ;;  %v1321_v56 = vmul.f32 0.05, %v1305_v29  ;;  %v1288_v0 = vadd.f32 %v1287_v24, %v1259_v49  ;;  %v2174_v49 = vld [vmem:[%s3345_s9] sm:$0xff]  ;;  %v2196_v24 = vld [vmem:[%s3345_s9 + $0xb0] sm:$0xff] }
 0x3ac   :  { %v3151_v34 = vmax.f32 %v1305_v29, %v1321_v56 }
 0x3ae   :  { %v1339_v13 = vmul.f32 %v2824_v43, %v3151_v34  ;;  %v1360_v54 = vmul.f32 %v3151_v34, %v3151_v34 }
 0x3af   :  { %v1306_v42 = vpop.f32.mrf.mxu1 }
 0x3b0   :  { %v1346_v60 = vadd.f32 %v1345_v50, %v1339_v13  ;;  %v1368_v10 = vmul.f32 %v2824_v43, %v1360_v54  ;;  %v1307_v59 = vadd.f32 %v1306_v42, %v1278_v58 }
 0x3b2   :  { %v1375_v61 = vadd.f32 %v1374_v22, %v1368_v10  ;;  %v1322_v33 = vmul.f32 0.05, %v1307_v59  ;;  %v2181_v10 = vld [vmem:[%s3345_s9 + $0x38] sm:$0xff] }
 0x3b3   :  { %1718 = vmatpush.bf16.msrb.mxu2 %v2181_v10 }
 0x3b4   :  { %v3159_v25 = vmax.f32 %v1307_v59, %v1322_v33  ;;  %v2189_v59 = vld [vmem:[%s3345_s9 + $0x78] sm:$0xff]  ;;  %v2180_v33 = vld [vmem:[%s3345_s9 + $0x30] sm:$0xff] }
 0x3b5   :  { %1732 = vmatpush.bf16.msrb.mxu3 %v2189_v59 }
 0x3b6   :  { %v1340_v20 = vmul.f32 %v2822_v38, %v3159_v25  ;;  %v1361_v46 = vmul.f32 %v3159_v25, %v3159_v25 }
 0x3b7   :  { %v1309_v1 = vpop.f32.mrf.mxu1  ;;  %1719 = vmatpush.bf16.msrb.mxu2 %v2180_v33  ;;  %v2200_v33 = vld [vmem:[%s3345_s9 + $0xd0] sm:$0xff] }
 0x3b8   :  { %v1347_v9 = vadd.f32 %v1346_v60, %v1340_v20  ;;  %v1369_v23 = vmul.f32 %v2822_v38, %v1361_v46  ;;  %v1310_v27 = vadd.f32 %v1309_v1, %v1281_v15 }
 0x3b9   :  { %1733 = vmatpush.bf16.msrb.mxu3 %v2188_v51 }
 0x3ba   :  { %v1376_v17 = vadd.f32 %v1375_v61, %v1369_v23  ;;  %v1323_v14 = vmul.f32 0.05, %v1310_v27 }
 0x3bb   :  { %1720 = vmatpush.bf16.msrb.mxu2 %v2179_v3 }
 0x3bc   :  { %v3170_v19 = vmax.f32 %v1310_v27, %v1323_v14  ;;  %v2186_v27 = vld [vmem:[%s3345_s9 + $0x60] sm:$0xff] }
 0x3be   :  { %v1362_v39 = vmul.f32 %v3170_v19, %v3170_v19  ;;  %v1341_v6 = vmul.f32 %v2824_v43, %v3170_v19 }
 0x3bf   :  { %v1311_v11 = vpop.f32.mrf.mxu1 }
 0x3c0   :  { %v1312_v5 = vadd.f32 %v1311_v11, %v1283_v12  ;;  %v1370_v52 = vmul.f32 %v2824_v43, %v1362_v39  ;;  %v1348_v36 = vadd.f32 %v1347_v9, %v1341_v6  ;;  %v2184_v39 = vld [vmem:[%s3345_s9 + $0x50] sm:$0xff]  ;;  %v2175_v6 = vld [vmem:[%s3345_s9 + $0x8] sm:$0xff] }
 0x3c2   :  { %v1324_v2 = vmul.f32 0.05, %v1312_v5  ;;  %v1377_v50 = vadd.f32 %v1376_v17, %v1370_v52  ;;  %v2178_v17 = vld [vmem:[%s3345_s9 + $0x20] sm:$0xff] }
 0x3c3   :  { %1721 = vmatpush.bf16.msrb.mxu2 %v2178_v17  ;;  %v2182_v52 = vld [vmem:[%s3345_s9 + $0x40] sm:$0xff] }
 0x3c4   :  { %v3172_v21 = vmax.f32 %v1312_v5, %v1324_v2  ;;  %v2185_v5 = vld [vmem:[%s3345_s9 + $0x58] sm:$0xff] }
 0x3c6   :  { %v1363_v63 = vmul.f32 %v3172_v21, %v3172_v21  ;;  %v1342_v31 = vmul.f32 %v2822_v38, %v3172_v21 }
 0x3c7   :  { %v1314_v48 = vpop.f32.mrf.mxu1  ;;  %1722 = vmatpush.bf16.msrb.mxu2 %v2177_v16 }
 0x3c8   :  { %v1315_v41 = vadd.f32 %v1314_v48, %v1286_v26  ;;  %v1371_v62 = vmul.f32 %v2822_v38, %v1363_v63  ;;  %v1349_v55 = vadd.f32 %v1348_v36, %v1342_v31  ;;  %v2183_v63 = vld [vmem:[%s3345_s9 + $0x48] sm:$0xff]  ;;  %v2197_v31 = vld [vmem:[%s3345_s9 + $0xb8] sm:$0xff]  ;;  %v2204_v36 = vld [vmem:[%s3345_s9 + $0xf0] sm:$0xff] }
 0x3ca   :  { %v1325_v53 = vmul.f32 0.05, %v1315_v41  ;;  %v1378_v56 = vadd.f32 %v1377_v50, %v1371_v62  ;;  %v2195_v50 = vld [vmem:[%s3345_s9 + $0xa8] sm:$0xff] }
 0x3cb   :  { %1723 = vmatpush.bf16.msrb.mxu2 %v2176_v30 }
 0x3cc   :  { %v3186_v47 = vmax.f32 %v1315_v41, %v1325_v53  ;;  %v2205_v53 = vld [vmem:[%s3345_s9 + $0xf8] sm:$0xff] }
 0x3ce   :  { %v1343_v29 = vmul.f32 %v2824_v43, %v3186_v47  ;;  %v1364_v57 = vmul.f32 %v3186_v47, %v3186_v47 }
 0x3cf   :  { %v1316_v22 = vpop.f32.mrf.mxu1  ;;  %1724 = vmatpush.bf16.msrb.mxu2 %v2175_v6 }
 0x3d0   :  { %v1350_v58 = vadd.f32 %v1349_v55, %v1343_v29  ;;  %v1372_v8 = vmul.f32 %v2824_v43, %v1364_v57  ;;  %v1317_v13 = vadd.f32 %v1316_v22, %v1288_v0  ;;  %v2203_v55 = vld [vmem:[%s3345_s9 + $0xe8] sm:$0xff]  ;;  %v2194_v22 = vld [vmem:[%s3345_s9 + $0xa0] sm:$0xff] }
 0x3d2   :  { %v1379_v54 = vadd.f32 %v1378_v56, %v1372_v8  ;;  %v1326_v42 = vmul.f32 0.05, %v1317_v13  ;;  %v2202_v56 = vld [vmem:[%s3345_s9 + $0xe0] sm:$0xff] }
 0x3d3   :  { %1725 = vmatpush.bf16.msrb.mxu2 %v2174_v49  ;;  %v1335_v8 = vld [vmem:[%s3346_s7] sm:$0x1] }
 0x3d4   :  { %v3193_v60 = vmax.f32 %v1317_v13, %v1326_v42  ;;  %v2201_v42 = vld [vmem:[%s3345_s9 + $0xd8] sm:$0xff] }
 0x3d6   :  { %v1344_v45 = vmul.f32 %v2822_v38, %v3193_v60  ;;  %v1365_v35 = vmul.f32 %v3193_v60, %v3193_v60 }
 0x3d7   :  { %1746 = vmatpush.bf16.msra.mxu2 %v2197_v31 }
 0x3d8   :  { %v1351_v43 = vadd.f32 %v1350_v58, %v1344_v45  ;;  %v1373_v61 = vmul.f32 %v2822_v38, %v1365_v35  ;;  %v2187_v38 = vld [vmem:[%s3345_s9 + $0x68] sm:$0xff]  ;;  %v1336_v45 = vld [vmem:[%s3347_s8] sm:$0x1] }
 0x3d9   :  { %1734 = vmatpush.bf16.msrb.mxu3 %v2187_v38 }
 0x3da   :  { %v1352_v20 = vrot.slane %v1351_v43, 4  ;;  %v1380_v46 = vadd.f32 %v1379_v54, %v1373_v61  ;;  %v2193_v54 = vld [vmem:[%s3345_s9 + $0x98] sm:$0xff]  ;;  %v2192_v61 = vld [vmem:[%s3345_s9 + $0x90] sm:$0xff] }
 0x3db   :  { %1747 = vmatpush.bf16.msra.mxu2 %v2196_v24 }
 0x3dc   :  { %v1353_v1 = vadd.f32 %v1352_v20, %v1351_v43  ;;  %v1381_v15 = vrot.slane %v1380_v46, 4 }
 0x3dd   :  { %1735 = vmatpush.bf16.msrb.mxu3 %v2186_v27 }
 0x3de   :  { %v1354_v7 = vrot.slane %v1353_v1, 2  ;;  %v1382_v9 = vadd.f32 %v1381_v15, %v1380_v46 }
 0x3df   :  { %1748 = vmatpush.bf16.msra.mxu2 %v2195_v50 }
 0x3e0   :  { %v1355_v23 = vadd.f32 %v1354_v7, %v1353_v1  ;;  %v1383_v4 = vrot.slane %v1382_v9, 2  ;;  %v2191_v7 = vld [vmem:[%s3345_s9 + $0x88] sm:$0xff] }
 0x3e1   :  { %1736 = vmatpush.bf16.msrb.mxu3 %v2185_v5  ;;  %v2190_v5 = vld [vmem:[%s3345_s9 + $0x80] sm:$0xff] }
 0x3e2   :  { %v1356_v44 = vrot.slane %v1355_v23, 1  ;;  %v1384_v12 = vadd.f32 %v1383_v4, %v1382_v9 }
 0x3e3   :  { %1749 = vmatpush.bf16.msra.mxu2 %v2194_v22 }
 0x3e4   :  { %v1357_v14 = vadd.f32 %v1356_v44, %v1355_v23  ;;  %v1385_v11 = vrot.slane %v1384_v12, 1 }
 0x3e5   :  { %1737 = vmatpush.bf16.msrb.mxu3 %v2184_v39 }
 0x3e6   :  { %v1386_v32 = vadd.f32 %v1385_v11, %v1384_v12  ;;  %v1387_v18 = vmul.f32 0.03125, %v1357_v14 }
 0x3e7   :  { %1750 = vmatpush.bf16.msra.mxu2 %v2193_v54 }
 0x3e8   :  { %v1388_v2 = vmul.f32 0.03125, %v1386_v32  ;;  %v1389_v26 = vmul.f32 %v1387_v18, %v1387_v18 }
 0x3e9   :  { %1738 = vmatpush.bf16.msrb.mxu3 %v2183_v63 }
 0x3ea   :  { %v1390_v37 = vsub.f32 %v1388_v2, %v1389_v26 }
 0x3eb   :  { %1751 = vmatpush.bf16.msra.mxu2 %v2192_v61 }
 0x3ec   :  { %v1391_v48 = vmax.f32 %v1390_v37, 0.0 }
 0x3ed   :  { %1739 = vmatpush.bf16.msrb.mxu3 %v2182_v52 }
 0x3ee   :  { %v1392_v41 = vadd.f32 1e-05, %v1391_v48 }
 0x3ef   :  { %1752 = vmatpush.bf16.msra.mxu2 %v2191_v7 }
 0x3f0   :  { %2402 = vrsqrt.f32 %v1392_v41  ;;  %vm1399_vm9 = vweird.f32 %v1392_v41 }
 0x3f1   :  { %1760 = vmatpush.bf16.msra.mxu3 %v2205_v53 }
 0x3f3   :  { %1753 = vmatpush.bf16.msra.mxu2 %v2190_v5 }
 0x3f5   :  { %1761 = vmatpush.bf16.msra.mxu3 %v2204_v36 }
 0x3f6   :  { %v2403_v62 = vpop.eup %2402 }
 0x3f7   :  { %v1394_v0 = vmul.f32 %v2403_v62, %v1392_v41  ;;  %vm1400_vm8 = vweird.f32 %v2403_v62 }
 0x3f8   :  { %vm1401_vm10 = vmor %vm1399_vm9, %vm1400_vm8 }
 0x3f9   :  { %v1395_v29 = vmul.f32 %v2403_v62, %v1394_v0  ;;  %1762 = vmatpush.bf16.msra.mxu3 %v2203_v55 }
 0x3fb   :  { %v1396_v57 = vmul.f32 0.5, %v1395_v29 }
 0x3fd   :  { %v1397_v58 = vsub.f32 1.5, %v1396_v57  ;;  %1763 = vmatpush.bf16.msra.mxu3 %v2202_v56 }
 0x3ff   :  { %v1398_v13 = vmul.f32 %v2403_v62, %v1397_v58 }
 0x401   :  { %v1402_v10 = vsel %vm1401_vm10, %v2403_v62, %v1398_v13  ;;  %1764 = vmatpush.bf16.msra.mxu3 %v2201_v42  ;;  %v2399_v62 = vld [vmem:[%s3344_s10] ss:$0 sm:$0xff] }
 0x402   :  { %v1403_v59 = vmul.f32 %v1402_v10, %v1335_v8 }
 0x404   :  { %v1404_v35 = vmul.f32 %v1403_v59, %v1387_v18  ;;  %v1406_v43 = vperm.slane %v1403_v59, 0 }
 0x405   :  { %1765 = vmatpush.bf16.msra.mxu3 %v2200_v33 }
 0x406   :  { %v1405_v51 = vsub.f32 %v1336_v45, %v1404_v35  ;;  %v1414_v20 = vmul.f32 %v1406_v43, %v3193_v60  ;;  %v1407_v46 = vmul.f32 %v1406_v43, %v3136_v28  ;;  %v1408_v1 = vmul.f32 %v1406_v43, %v3140_v40  ;;  %v2199_v60 = vld [vmem:[%s3345_s9 + $0xc8] sm:$0xff] }
 0x407   :  { %v1409_v15 = vmul.f32 %v1406_v43, %v3151_v34  ;;  %v1410_v3 = vmul.f32 %v1406_v43, %v3159_v25  ;;  %v1413_v9 = vmul.f32 %v1406_v43, %v3186_v47  ;;  %v1411_v28 = vmul.f32 %v1406_v43, %v3170_v19 }
 0x408   :  { %v1416_v38 = vperm.slane %v1405_v51, 0  ;;  %v1412_v40 = vmul.f32 %v1406_v43, %v3172_v21  ;;  %v2198_v21 = vld [vmem:[%s3345_s9 + $0xc0] sm:$0xff] }
 0x409   :  { %1766 = vmatpush.bf16.msra.mxu3 %v2199_v60 }
 0x40a   :  { %v1425_v34 = vadd.f32 %v1416_v38, %v1414_v20  ;;  %v1418_v23 = vadd.f32 %v1416_v38, %v1407_v46  ;;  %v1419_v25 = vadd.f32 %v1416_v38, %v1408_v1  ;;  %v1420_v4 = vadd.f32 %v1416_v38, %v1409_v15 }
 0x40b   :  { %v1421_v17 = vadd.f32 %v1416_v38, %v1410_v3  ;;  %v1422_v27 = vadd.f32 %v1416_v38, %v1411_v28  ;;  %v1423_v44 = vadd.f32 %v1416_v38, %v1412_v40  ;;  %v1424_v12 = vadd.f32 %v1416_v38, %v1413_v9 }
 0x40c   :  { %v1433_v14 = vpack.c.bf16 %v1425_v34, %v1425_v34  ;;  %v1426_v11 = vpack.c.bf16 %v1418_v23, %v1418_v23  ;;  %v1427_v16 = vpack.c.bf16 %v1419_v25, %v1419_v25  ;;  %v1428_v47 = vpack.c.bf16 %v1420_v4, %v1420_v4 }
 0x40d   :  { %v1429_v19 = vpack.c.bf16 %v1421_v17, %v1421_v17  ;;  %v1430_v32 = vpack.c.bf16 %v1422_v27, %v1422_v27  ;;  %v1431_v18 = vpack.c.bf16 %v1423_v44, %v1423_v44  ;;  %v1432_v2 = vpack.c.bf16 %v1424_v12, %v1424_v12  ;;  %1767 = vmatpush.bf16.msra.mxu3 %v2198_v21 }
 0x40e   :  { %v1436_v26 = vunpack.c.l.b16 %v1426_v11  ;;  %v1437_v30 = vunpack.c.l.b16 %v1427_v16  ;;  %v1442_v39 = vunpack.c.l.b16 %v1428_v47  ;;  %v1455_v37 = vunpack.c.l.b16 %v1433_v14 }
 0x40f   :  { %v1443_v48 = vunpack.c.l.b16 %v1429_v19  ;;  %v1448_v6 = vunpack.c.l.b16 %v1430_v32  ;;  %v1449_v63 = vunpack.c.l.b16 %v1431_v18  ;;  %v1454_v41 = vunpack.c.l.b16 %v1432_v2 }
 0x410   :  { %v1438_v49 = vpack.c.b16 %v1437_v30, %v1436_v26 }
 0x411   :  { %v1444_v52 = vpack.c.b16 %v1443_v48, %v1442_v39  ;;  %v1450_v31 = vpack.c.b16 %v1449_v63, %v1448_v6  ;;  %v1456_v53 = vpack.c.b16 %v1455_v37, %v1454_v41  ;;  %v1818_v37 = vld [vmem:[%s3348_s11] sm:$0x1] }
 0x412   :  { %1726 = vmatmul.bf16.vlgmr.msrb.gmra.mxu2 %v1438_v49  ;;  %v1820_v6 = vld [vmem:[%s3349_s13] sm:$0x1] }
 0x413   :  { %1740 = vmatmul.bf16.vlgmr.msrb.gmra.mxu3 %v1444_v52  ;;  %v1822_v63 = vld [vmem:[%s3350_s12] sm:$0x1] }
 0x414   :  { %v1823_v52 = vmul.f32 %v1822_v63, %v1820_v6 }
 0x422   :  { %1754 = vmatmul.bf16.vlgmr.msra.gmra.mxu2 %v1450_v31 }
 0x423   :  { %1768 = vmatmul.bf16.vlgmr.msra.gmra.mxu3 %v1456_v53 }
 0x495   :  { %v1727_v24 = vpop.f32.mrf.mxu2 }
 0x496   :  { %v1741_v36 = vpop.f32.mrf.mxu3  ;;  %v1728_v55 = vadd.f32 %v2399_v62, %v1727_v24 }
 0x498   :  { %v1742_v29 = vadd.f32 %v1741_v36, %v1728_v55 }
 0x49d   :  { %v1729_v0 = vpop.f32.mrf.mxu2 }
 0x49e   :  { %v1743_v50 = vpop.f32.mrf.mxu3  ;;  %v1730_v58 = vadd.f32 %v2399_v62, %v1729_v0 }
 0x4a0   :  { %v1744_v13 = vadd.f32 %v1743_v50, %v1730_v58 }
 0x4a5   :  { %v1755_v57 = vpop.f32.mrf.mxu2 }
 0x4a6   :  { %v1756_v22 = vadd.f32 %v1755_v57, %v1742_v29  ;;  %v1769_v56 = vpop.f32.mrf.mxu3  ;;  %v20_v29 = vstv %s3351_s14 }
 0x4a7   :  { %21 = vst [vmem:[#allocation2] sm:$0x1] %v20_v29 }
 0x4a8   :  { %v1770_v8 = vadd.f32 %v1769_v56, %v1756_v22 }
 0x4aa   :  { %v1774_v42 = vmul.f32 0.05, %v1770_v8 }
 0x4ac   :  { %v1776_v35 = vmax.f32 %v1770_v8, %v1774_v42 }
 0x4ad   :  { %v1757_v54 = vpop.f32.mrf.mxu2 }
 0x4ae   :  { %v1758_v10 = vadd.f32 %v1757_v54, %v1744_v13  ;;  %v1771_v59 = vpop.f32.mrf.mxu3  ;;  %v1789_v33 = vmul.f32 %v1776_v35, %v1776_v35  ;;  %v1780_v46 = vsel %vm582_vm7, %v1776_v35, 0.0  ;;  %v1830_v57 = vld [vmem:[#allocation2] sm:$0x1] }
 0x4b0   :  { %v1772_v45 = vadd.f32 %v1771_v59, %v1758_v10  ;;  %v1793_v38 = vsel %vm582_vm7, %v1789_v33, 0.0 }
 0x4b2   :  { %v1775_v43 = vmul.f32 0.05, %v1772_v45 }
 0x4b4   :  { %v1777_v61 = vmax.f32 %v1772_v45, %v1775_v43 }
 0x4b6   :  { %v1779_v51 = vmul.f32 0.0, %v1777_v61  ;;  %v1790_v20 = vmul.f32 %v1777_v61, %v1777_v61 }
 0x4b8   :  { %v1781_v1 = vsel %vm582_vm7, %v1779_v51, 0.0  ;;  %v1792_v15 = vmul.f32 0.0, %v1790_v20 }
 0x4b9   :  { %v1782_v3 = vadd.f32 %v1781_v1, %v1780_v46 }
 0x4ba   :  { %v1794_v7 = vsel %vm582_vm7, %v1792_v15, 0.0 }
 0x4bb   :  { %v1783_v9 = vrot.slane %v1782_v3, 4  ;;  %v1795_v60 = vadd.f32 %v1794_v7, %v1793_v38 }
 0x4bd   :  { %v1784_v28 = vadd.f32 %v1783_v9, %v1782_v3  ;;  %v1796_v40 = vrot.slane %v1795_v60, 4 }
 0x4bf   :  { %v1785_v34 = vrot.slane %v1784_v28, 2  ;;  %v1797_v23 = vadd.f32 %v1796_v40, %v1795_v60 }
 0x4c1   :  { %v1786_v25 = vadd.f32 %v1785_v34, %v1784_v28  ;;  %v1798_v4 = vrot.slane %v1797_v23, 2 }
 0x4c3   :  { %v1787_v17 = vrot.slane %v1786_v25, 1  ;;  %v1799_v27 = vadd.f32 %v1798_v4, %v1797_v23 }
 0x4c5   :  { %v1788_v44 = vadd.f32 %v1787_v17, %v1786_v25  ;;  %v1800_v12 = vrot.slane %v1799_v27, 1 }
 0x4c7   :  { %v1801_v14 = vadd.f32 %v1800_v12, %v1799_v27  ;;  %v1802_v11 = vmul.f32 0.125, %v1788_v44 }
 0x4c9   :  { %v1803_v16 = vmul.f32 0.125, %v1801_v14  ;;  %v1804_v47 = vmul.f32 %v1802_v11, %v1802_v11 }
 0x4cb   :  { %v1805_v5 = vsub.f32 %v1803_v16, %v1804_v47 }
 0x4cd   :  { %v1806_v19 = vmax.f32 %v1805_v5, 0.0 }
 0x4cf   :  { %v1807_v21 = vadd.f32 1e-05, %v1806_v19 }
 0x4d1   :  { %2404 = vrsqrt.f32 %v1807_v21  ;;  %vm1814_vm12 = vweird.f32 %v1807_v21 }
 0x4d7   :  { %v2405_v32 = vpop.eup %2404 }
 0x4d8   :  { %v1809_v18 = vmul.f32 %v2405_v32, %v1807_v21  ;;  %vm1815_vm11 = vweird.f32 %v2405_v32 }
 0x4d9   :  { %vm1816_vm13 = vmor %vm1814_vm12, %vm1815_vm11 }
 0x4da   :  { %v1810_v2 = vmul.f32 %v2405_v32, %v1809_v18 }
 0x4dc   :  { %v1811_v26 = vmul.f32 0.5, %v1810_v2 }
 0x4de   :  { %v1812_v30 = vsub.f32 1.5, %v1811_v26 }
 0x4e0   :  { %v1813_v39 = vmul.f32 %v2405_v32, %v1812_v30 }
 0x4e2   :  { %v1817_v48 = vsel %vm1816_vm13, %v2405_v32, %v1813_v39 }
 0x4e3   :  { %v1819_v41 = vmul.f32 %v1818_v37, %v1817_v48 }
 0x4e5   :  { %v1821_v49 = vmul.f32 %v1820_v6, %v1819_v41 }
 0x4e7   :  { %v1832_v31 = vperm.slane %v1821_v49, 0  ;;  %v1824_v53 = vmul.f32 %v1821_v49, %v1802_v11 }
 0x4e9   :  { %v1834_v24 = vmul.f32 %v1832_v31, %v1777_v61  ;;  %v1833_v36 = vmul.f32 %v1832_v31, %v1776_v35  ;;  %v1825_v62 = vsub.f32 %v1823_v52, %v1824_v53 }
 0x4eb   :  { %v1838_v0 = vsel %vm582_vm7, %v1834_v24, 0.0  ;;  %v1835_v50 = vsel %vm582_vm7, %v1833_v36, 0.0  ;;  %v1827_v55 = vsel %vm1826_vm14, %v1825_v62, 0.0  ;;  %vm1848_vm7 = vcmask 7168  }
 0x4ec   :  { %1839 = vadd.xlane.f32.xlu0 %v1838_v0  ;;  %1836 = vadd.xlane.f32.xlu2 %v1835_v50 }
 0x4ed   :  { %1828 = vadd.xlane.f32.xlu1 %v1827_v55 }
 0x55f   :  { %v1840_v8 = vpop.xlane.xlu0 %1839  ;;  %v1837_v13 = vpop.xlane.xlu2 %1836 }
 0x560   :  { %v1829_v22 = vpop.xlane.xlu1 %1828 }
 0x561   :  { %v1831_v56 = vadd.f32 %v1830_v57, %v1829_v22 }
 0x563   :  { %v1841_v58 = vperm.slane %v1831_v56, 0 }
 0x565   :  { %v1842_v54 = vadd.f32 %v1841_v58, %v1837_v13  ;;  %v1843_v42 = vadd.f32 %v1841_v58, %v1840_v8 }
 0x567   :  { %v1844_v10 = vmul.f32 1.442695, %v1842_v54  ;;  %v1846_v59 = vmul.f32 1.442695, %v1843_v42 }
 0x569   :  { %2406 = vpow2.f32 %v1844_v10 }
 0x56a   :  { %2408 = vpow2.f32 %v1846_v59 }
 0x56f   :  { %v2407_v45 = vpop.eup %2406 }
 0x570   :  { %v2409_v35 = vpop.eup %2408  ;;  %1849 = vst.msk [vmem:[%s3352_s15] sm:$0xff] %vm1848_vm7, %v2407_v45 }
 0x571   :  { %1850 = vst.msk [vmem:[%s3352_s15 + $0x8] sm:$0xff] %vm1848_vm7, %v2409_v35 }

</bundles_post_ra>
